<compile_context>
chip_gen: v7x
topology: tpu7x:2x2x1
jax: 0.10.0
libtpu: 0.0.40
codegen_flags: <defaults>
</compile_context>

<pallas_src>
import functools

import numpy as np
import jax
import jax.numpy as jnp
from jax.experimental import pallas as pl
from jax.experimental.pallas import tpu as pltpu

EPS = 1e-5
_PAD = 128                                        # lane padding for shifted reads
_TAPS = tuple((dy, dx) for dy in (-1, 0, 1) for dx in (-1, 0, 1))


def _vmem_limit_bytes():
    """Per-generation VMEM budget instead of a hard-coded constant."""
    try:
        phys = pltpu.get_tpu_info().vmem_capacity_bytes
    except Exception:                              # conservative fallback
        phys = 64 * 1024 * 1024
    return int(min(max(phys * 3 // 4, 16 * 1024 * 1024), 100 * 1024 * 1024))


def _tap_masks(H, W):
    """0/1 masks (one per 3x3 tap) zeroing reads that fall outside the image."""
    M = H * W
    r = np.arange(M) // W
    c = np.arange(M) % W
    masks = []
    for dy, dx in _TAPS:
        ok = np.ones(M, np.float32)
        if dy == -1:
            ok = ok * (r >= 1)
        if dy == 1:
            ok = ok * (r <= H - 2)
        if dx == -1:
            ok = ok * (c >= 1)
        if dx == 1:
            ok = ok * (c <= W - 2)
        masks.append(ok.astype(np.float32))
    return jnp.asarray(np.stack(masks).reshape(9, 1, M))


def _conv3x3(src, w_ref, b_ref, mask_ref, xp_ref, patch_ref, *, H, W, C):
    """3x3 'same' conv of one image in channels-on-sublane flat layout.

    src      : (C, H*W) f32 value (image / activation).
    w_ref    : (C, 9*C) bf16 ref, columns ordered (ky, kx, ci).
    b_ref    : (C, 1)  f32 ref (conv bias).
    mask_ref : (9, 1, H*W) f32 ref of 0/1 boundary masks.
    xp_ref   : (C, H*W + 2*_PAD) f32 scratch (lane-padded copy; pads stay 0).
    patch_ref: (9*C, H*W) bf16 scratch (transposed im2col patch).
    returns  : (C, H*W) f32 conv output (bias included).
    """
    M = H * W
    # Lane-padded copy so every tap is a static lane-offset read (aligned store).
    xp_ref[:, _PAD:_PAD + M] = src
    for t, (dy, dx) in enumerate(_TAPS):
        s = dy * W + dx
        tap = xp_ref[:, _PAD + s:_PAD + s + M]      # (C, M) shifted read (XLU)
        if (dy, dx) != (0, 0):
            tap = tap * mask_ref[t]                 # zero outside the image
        # Full-lane-width bf16 store, sublane-aligned for bf16 tiling.
        patch_ref[t * C:(t + 1) * C, :] = tap.astype(jnp.bfloat16)
    # One MXU matmul per image: (C, 9C) @ (9C, M) -> (C, M), bf16 in / f32 acc.
    return jnp.dot(w_ref[...], patch_ref[...],
                   preferred_element_type=jnp.float32) + b_ref[...]


def _residual_block_kernel(x_ref, mask_ref,
                           w1_ref, b1_ref, g1_ref, be1_ref, alpha_ref,
                           w2_ref, b2_ref, g2_ref, be2_ref,
                           out_ref, z1_ref, xp_ref, patch_ref,
                           *, N, C, H, W):
    M = H * W
    inv_cnt = 1.0 / float(N * M)

    # Zero the shifted-read buffer once; the interior is overwritten for every
    # conv application and the lane pads stay zero for the whole kernel.
    xp_ref[...] = jnp.zeros_like(xp_ref)

    # ---- conv1 over the batch + exact two-pass BN1 statistics --------------
    s1 = jnp.zeros((C, 1), jnp.float32)
    for n in range(N):
        z = _conv3x3(x_ref[n], w1_ref, b1_ref, mask_ref, xp_ref, patch_ref,
                     H=H, W=W, C=C)
        z1_ref[n] = z
        s1 = s1 + jnp.sum(z, axis=1, keepdims=True)
    mean1 = s1 * inv_cnt
    v1 = jnp.zeros((C, 1), jnp.float32)
    for n in range(N):
        d = z1_ref[n] - mean1
        v1 = v1 + jnp.sum(d * d, axis=1, keepdims=True)
    scale1 = g1_ref[...] * jax.lax.rsqrt(v1 * inv_cnt + EPS)
    shift1 = be1_ref[...] - mean1 * scale1

    # ---- BN1 affine + PReLU + conv2 + exact two-pass BN2 statistics --------
    s2 = jnp.zeros((C, 1), jnp.float32)
    for n in range(N):
        y = z1_ref[n] * scale1 + shift1
        y = jnp.where(y >= 0.0, y, alpha_ref[...] * y)        # PReLU (shared alpha)
        z = _conv3x3(y, w2_ref, b2_ref, mask_ref, xp_ref, patch_ref,
                     H=H, W=W, C=C)
        out_ref[n] = z                       # stash pre-BN conv2 output in place
        s2 = s2 + jnp.sum(z, axis=1, keepdims=True)
    mean2 = s2 * inv_cnt
    v2 = jnp.zeros((C, 1), jnp.float32)
    for n in range(N):
        d = out_ref[n] - mean2
        v2 = v2 + jnp.sum(d * d, axis=1, keepdims=True)
    scale2 = g2_ref[...] * jax.lax.rsqrt(v2 * inv_cnt + EPS)
    shift2 = be2_ref[...] - mean2 * scale2

    # ---- BN2 affine + residual add ------------------------------------------
    for n in range(N):
        out_ref[n] = out_ref[n] * scale2 + shift2 + x_ref[n]


def residual_block(x_nchw, params):
    """Forward pass of the SRGAN ResidualBlock (training-mode BatchNorm)."""
    N, C, H, W = x_nchw.shape
    M = H * W
    assert W + 1 <= _PAD, "image width too large for the fixed lane padding"

    # Channels-on-sublane flat layout: pure reshape, no NCHW<->NHWC transpose.
    x = x_nchw.reshape(N, C, M).astype(jnp.float32)

    # HWIO (3,3,Cin,Cout) -> (Cout, 9*Cin), column order (ky, kx, ci); bf16 MXU.
    def prep_w(w):
        return jnp.transpose(w, (3, 0, 1, 2)).reshape(C, 9 * C).astype(jnp.bfloat16)

    w1, w2 = prep_w(params["w1"]), prep_w(params["w2"])
    b1 = params["b1"].reshape(C, 1).astype(jnp.float32)
    b2 = params["b2"].reshape(C, 1).astype(jnp.float32)
    g1 = params["g1"].reshape(C, 1).astype(jnp.float32)
    be1 = params["be1"].reshape(C, 1).astype(jnp.float32)
    g2 = params["g2"].reshape(C, 1).astype(jnp.float32)
    be2 = params["be2"].reshape(C, 1).astype(jnp.float32)
    alpha = params["alpha"].reshape(1, 1).astype(jnp.float32)
    masks = _tap_masks(H, W)

    # The fused single-launch path keeps x, z1, z2 and the conv scratch in
    # VMEM; beyond this budget a multi-pass (grid over N / row-band) variant
    # is required instead.
    fused_bytes = (4 * (3 * N * C * M)              # x + z1 + out (f32)
                   + 4 * C * (M + 2 * _PAD)         # shifted-read buffer (f32)
                   + 2 * 9 * C * M                  # im2col patch (bf16)
                   + 2 * 2 * 9 * C * C              # both conv weights (bf16)
                   + 4 * 9 * M)                     # boundary masks
    assert fused_bytes < 24 * 1024 * 1024, (
        "fused ResidualBlock kernel assumes the whole batch fits in VMEM")

    def full(shape):
        return pl.BlockSpec(shape, lambda *_: (0,) * len(shape))

    vec = full((C, 1))
    cost = pl.CostEstimate(
        flops=2 * (2 * N * M * 9 * C * C),
        transcendentals=0,
        bytes_accessed=4 * (2 * N * C * M) + 2 * (2 * 9 * C * C) + 4 * 9 * M)

    out = pl.pallas_call(
        functools.partial(_residual_block_kernel, N=N, C=C, H=H, W=W),
        grid=(1,),
        in_specs=[full((N, C, M)), full((9, 1, M)),
                  full((C, 9 * C)), vec, vec, vec, full((1, 1)),
                  full((C, 9 * C)), vec, vec, vec],
        out_specs=full((N, C, M)),
        out_shape=jax.ShapeDtypeStruct((N, C, M), jnp.float32),
        scratch_shapes=[pltpu.VMEM((N, C, M), jnp.float32),          # z1
                        pltpu.VMEM((C, M + 2 * _PAD), jnp.float32),  # shifted reads
                        pltpu.VMEM((9 * C, M), jnp.bfloat16)],       # im2col patch
        compiler_params=pltpu.CompilerParams(
            dimension_semantics=("arbitrary",),
            vmem_limit_bytes=_vmem_limit_bytes()),
        cost_estimate=cost,
    )(x, masks, w1, b1, g1, be1, alpha, w2, b2, g2, be2)

    return out.reshape(N, C, H, W)


def make_params(key, C):
    ks = jax.random.split(key, 8)
    return {
        # conv weights in HWIO layout (kh, kw, Cin, Cout)
        "w1": 0.05 * jax.random.normal(ks[0], (3, 3, C, C), jnp.float32),
        "b1": 0.01 * jax.random.normal(ks[1], (1, C), jnp.float32),
        "g1": 1.0 + 0.1 * jax.random.normal(ks[2], (1, C), jnp.float32),
        "be1": 0.1 * jax.random.normal(ks[3], (1, C), jnp.float32),
        "alpha": jnp.full((1, 1), 0.25, jnp.float32),        # nn.PReLU() default
        "w2": 0.05 * jax.random.normal(ks[4], (3, 3, C, C), jnp.float32),
        "b2": 0.01 * jax.random.normal(ks[5], (1, C), jnp.float32),
        "g2": 1.0 + 0.1 * jax.random.normal(ks[6], (1, C), jnp.float32),
        "be2": 0.1 * jax.random.normal(ks[7], (1, C), jnp.float32),
    }


if __name__ == "__main__":
    N, C, H, W = 2, 16, 16, 16      # small ResidualBlock(k=3, n=16, s=1) instance
    key = jax.random.PRNGKey(0)
    kx, kp = jax.random.split(key)
    x = jax.random.normal(kx, (N, C, H, W), jnp.float32)   # NCHW, like PyTorch
    params = make_params(kp, C)

    out = jax.jit(residual_block)(x, params)
    jax.block_until_ready(out)
    assert out.shape == (N, C, H, W)
    print("KERNEL_OK")
</pallas_src>

<mosaic_0001>
module attributes {stable_mosaic.version = 11 : i64} {
  func.func @_residual_block_kernel(%arg0: i32, %arg1: memref<2x16x256xf32, #tpu.memory_space<vmem>>, %arg2: memref<9x1x256xf32, #tpu.memory_space<vmem>>, %arg3: memref<16x144xbf16, #tpu.memory_space<vmem>>, %arg4: memref<16x1xf32, #tpu.memory_space<vmem>>, %arg5: memref<16x1xf32, #tpu.memory_space<vmem>>, %arg6: memref<16x1xf32, #tpu.memory_space<vmem>>, %arg7: memref<1x1xf32, #tpu.memory_space<vmem>>, %arg8: memref<16x144xbf16, #tpu.memory_space<vmem>>, %arg9: memref<16x1xf32, #tpu.memory_space<vmem>>, %arg10: memref<16x1xf32, #tpu.memory_space<vmem>>, %arg11: memref<16x1xf32, #tpu.memory_space<vmem>>, %arg12: memref<2x16x256xf32, #tpu.memory_space<vmem>>, %arg13: memref<2x16x256xf32, #tpu.memory_space<vmem>>, %arg14: memref<16x512xf32, #tpu.memory_space<vmem>>, %arg15: memref<144x256xbf16, #tpu.memory_space<vmem>>) attributes {dimension_semantics = [#tpu.dimension_semantics<arbitrary>], iteration_bounds = array<i64: 1>, scalar_prefetch = 0 : i64, scratch_operands = 3 : i64, tpu.core_type = #tpu.core_type<tc>, window_params = [{pipeline_mode = #tpu.pipeline_mode<synchronous>, transform_indices = @transform_0, window_bounds = array<i64: 2, 16, 256>}, {pipeline_mode = #tpu.pipeline_mode<synchronous>, transform_indices = @transform_1, window_bounds = array<i64: 9, 1, 256>}, {pipeline_mode = #tpu.pipeline_mode<synchronous>, transform_indices = @transform_2, window_bounds = array<i64: 16, 144>}, {pipeline_mode = #tpu.pipeline_mode<synchronous>, transform_indices = @transform_3, window_bounds = array<i64: 16, 1>}, {pipeline_mode = #tpu.pipeline_mode<synchronous>, transform_indices = @transform_4, window_bounds = array<i64: 16, 1>}, {pipeline_mode = #tpu.pipeline_mode<synchronous>, transform_indices = @transform_5, window_bounds = array<i64: 16, 1>}, {pipeline_mode = #tpu.pipeline_mode<synchronous>, transform_indices = @transform_6, window_bounds = array<i64: 1, 1>}, {pipeline_mode = #tpu.pipeline_mode<synchronous>, transform_indices = @transform_7, window_bounds = array<i64: 16, 144>}, {pipeline_mode = #tpu.pipeline_mode<synchronous>, transform_indices = @transform_8, window_bounds = array<i64: 16, 1>}, {pipeline_mode = #tpu.pipeline_mode<synchronous>, transform_indices = @transform_9, window_bounds = array<i64: 16, 1>}, {pipeline_mode = #tpu.pipeline_mode<synchronous>, transform_indices = @transform_10, window_bounds = array<i64: 16, 1>}, {pipeline_mode = #tpu.pipeline_mode<synchronous>, transform_indices = @transform_11, window_bounds = array<i64: 2, 16, 256>}]} {
    %cst = arith.constant 0.000000e+00 : f32
    %0 = vector.broadcast %cst : f32 to vector<16x512xf32>
    %c0 = arith.constant 0 : index
    %c0_0 = arith.constant 0 : index
    %1 = vector.load %arg14[%c0, %c0_0] : memref<16x512xf32, #tpu.memory_space<vmem>>, vector<16x512xf32>
    tpu.vector_store %arg14[%c0, %c0_0], %0 {strides = array<i32>} : memref<16x512xf32, #tpu.memory_space<vmem>>, vector<16x512xf32>,
    %cst_1 = arith.constant 0.000000e+00 : f32
    %2 = vector.broadcast %cst_1 : f32 to vector<16x1xf32>
    %c0_2 = arith.constant 0 : index
    %c0_3 = arith.constant 0 : index
    %c0_4 = arith.constant 0 : index
    %3 = vector.load %arg1[%c0_2, %c0_3, %c0_4] : memref<2x16x256xf32, #tpu.memory_space<vmem>>, vector<1x16x256xf32>
    %4 = vector.shape_cast %3 : vector<1x16x256xf32> to vector<16x256xf32>
    %c0_5 = arith.constant 0 : index
    %c128 = arith.constant 128 : index
    %5 = vector.load %arg14[%c0_5, %c128] : memref<16x512xf32, #tpu.memory_space<vmem>>, vector<16x256xf32>
    tpu.vector_store %arg14[%c0_5, %c128], %4 {strides = array<i32>} : memref<16x512xf32, #tpu.memory_space<vmem>>, vector<16x256xf32>,
    %c0_6 = arith.constant 0 : index
    %c111 = arith.constant 111 : index
    %6 = vector.load %arg14[%c0_6, %c111] : memref<16x512xf32, #tpu.memory_space<vmem>>, vector<16x256xf32>
    %c0_7 = arith.constant 0 : index
    %c0_8 = arith.constant 0 : index
    %c0_9 = arith.constant 0 : index
    %7 = vector.load %arg2[%c0_7, %c0_8, %c0_9] : memref<9x1x256xf32, #tpu.memory_space<vmem>>, vector<1x1x256xf32>
    %8 = vector.shape_cast %7 : vector<1x1x256xf32> to vector<1x256xf32>
    %9 = vector.broadcast %8 : vector<1x256xf32> to vector<16x256xf32>
    %10 = arith.mulf %6, %9 : vector<16x256xf32>
    %11 = arith.truncf %10 : vector<16x256xf32> to vector<16x256xbf16>
    %c0_10 = arith.constant 0 : index
    %c0_11 = arith.constant 0 : index
    %12 = vector.load %arg15[%c0_10, %c0_11] : memref<144x256xbf16, #tpu.memory_space<vmem>>, vector<16x256xbf16>
    tpu.vector_store %arg15[%c0_10, %c0_11], %11 {strides = array<i32>} : memref<144x256xbf16, #tpu.memory_space<vmem>>, vector<16x256xbf16>,
    %c0_12 = arith.constant 0 : index
    %c112 = arith.constant 112 : index
    %13 = vector.load %arg14[%c0_12, %c112] : memref<16x512xf32, #tpu.memory_space<vmem>>, vector<16x256xf32>
    %c1 = arith.constant 1 : index
    %c0_13 = arith.constant 0 : index
    %c0_14 = arith.constant 0 : index
    %14 = vector.load %arg2[%c1, %c0_13, %c0_14] : memref<9x1x256xf32, #tpu.memory_space<vmem>>, vector<1x1x256xf32>
    %15 = vector.shape_cast %14 : vector<1x1x256xf32> to vector<1x256xf32>
    %16 = vector.broadcast %15 : vector<1x256xf32> to vector<16x256xf32>
    %17 = arith.mulf %13, %16 : vector<16x256xf32>
    %18 = arith.truncf %17 : vector<16x256xf32> to vector<16x256xbf16>
    %c16 = arith.constant 16 : index
    %c0_15 = arith.constant 0 : index
    %19 = vector.load %arg15[%c16, %c0_15] : memref<144x256xbf16, #tpu.memory_space<vmem>>, vector<16x256xbf16>
    tpu.vector_store %arg15[%c16, %c0_15], %18 {strides = array<i32>} : memref<144x256xbf16, #tpu.memory_space<vmem>>, vector<16x256xbf16>,
    %c0_16 = arith.constant 0 : index
    %c113 = arith.constant 113 : index
    %20 = vector.load %arg14[%c0_16, %c113] : memref<16x512xf32, #tpu.memory_space<vmem>>, vector<16x256xf32>
    %c2 = arith.constant 2 : index
    %c0_17 = arith.constant 0 : index
    %c0_18 = arith.constant 0 : index
    %21 = vector.load %arg2[%c2, %c0_17, %c0_18] : memref<9x1x256xf32, #tpu.memory_space<vmem>>, vector<1x1x256xf32>
    %22 = vector.shape_cast %21 : vector<1x1x256xf32> to vector<1x256xf32>
    %23 = vector.broadcast %22 : vector<1x256xf32> to vector<16x256xf32>
    %24 = arith.mulf %20, %23 : vector<16x256xf32>
    %25 = arith.truncf %24 : vector<16x256xf32> to vector<16x256xbf16>
    %c32 = arith.constant 32 : index
    %c0_19 = arith.constant 0 : index
    %26 = vector.load %arg15[%c32, %c0_19] : memref<144x256xbf16, #tpu.memory_space<vmem>>, vector<16x256xbf16>
    tpu.vector_store %arg15[%c32, %c0_19], %25 {strides = array<i32>} : memref<144x256xbf16, #tpu.memory_space<vmem>>, vector<16x256xbf16>,
    %c0_20 = arith.constant 0 : index
    %c127 = arith.constant 127 : index
    %27 = vector.load %arg14[%c0_20, %c127] : memref<16x512xf32, #tpu.memory_space<vmem>>, vector<16x256xf32>
    %c3 = arith.constant 3 : index
    %c0_21 = arith.constant 0 : index
    %c0_22 = arith.constant 0 : index
    %28 = vector.load %arg2[%c3, %c0_21, %c0_22] : memref<9x1x256xf32, #tpu.memory_space<vmem>>, vector<1x1x256xf32>
    %29 = vector.shape_cast %28 : vector<1x1x256xf32> to vector<1x256xf32>
    %30 = vector.broadcast %29 : vector<1x256xf32> to vector<16x256xf32>
    %31 = arith.mulf %27, %30 : vector<16x256xf32>
    %32 = arith.truncf %31 : vector<16x256xf32> to vector<16x256xbf16>
    %c48 = arith.constant 48 : index
    %c0_23 = arith.constant 0 : index
    %33 = vector.load %arg15[%c48, %c0_23] : memref<144x256xbf16, #tpu.memory_space<vmem>>, vector<16x256xbf16>
    tpu.vector_store %arg15[%c48, %c0_23], %32 {strides = array<i32>} : memref<144x256xbf16, #tpu.memory_space<vmem>>, vector<16x256xbf16>,
    %c0_24 = arith.constant 0 : index
    %c128_25 = arith.constant 128 : index
    %34 = vector.load %arg14[%c0_24, %c128_25] : memref<16x512xf32, #tpu.memory_space<vmem>>, vector<16x256xf32>
    %35 = arith.truncf %34 : vector<16x256xf32> to vector<16x256xbf16>
    %c64 = arith.constant 64 : index
    %c0_26 = arith.constant 0 : index
    %36 = vector.load %arg15[%c64, %c0_26] : memref<144x256xbf16, #tpu.memory_space<vmem>>, vector<16x256xbf16>
    tpu.vector_store %arg15[%c64, %c0_26], %35 {strides = array<i32>} : memref<144x256xbf16, #tpu.memory_space<vmem>>, vector<16x256xbf16>,
    %c0_27 = arith.constant 0 : index
    %c129 = arith.constant 129 : index
    %37 = vector.load %arg14[%c0_27, %c129] : memref<16x512xf32, #tpu.memory_space<vmem>>, vector<16x256xf32>
    %c5 = arith.constant 5 : index
    %c0_28 = arith.constant 0 : index
    %c0_29 = arith.constant 0 : index
    %38 = vector.load %arg2[%c5, %c0_28, %c0_29] : memref<9x1x256xf32, #tpu.memory_space<vmem>>, vector<1x1x256xf32>
    %39 = vector.shape_cast %38 : vector<1x1x256xf32> to vector<1x256xf32>
    %40 = vector.broadcast %39 : vector<1x256xf32> to vector<16x256xf32>
    %41 = arith.mulf %37, %40 : vector<16x256xf32>
    %42 = arith.truncf %41 : vector<16x256xf32> to vector<16x256xbf16>
    %c80 = arith.constant 80 : index
    %c0_30 = arith.constant 0 : index
    %43 = vector.load %arg15[%c80, %c0_30] : memref<144x256xbf16, #tpu.memory_space<vmem>>, vector<16x256xbf16>
    tpu.vector_store %arg15[%c80, %c0_30], %42 {strides = array<i32>} : memref<144x256xbf16, #tpu.memory_space<vmem>>, vector<16x256xbf16>,
    %c0_31 = arith.constant 0 : index
    %c143 = arith.constant 143 : index
    %44 = vector.load %arg14[%c0_31, %c143] : memref<16x512xf32, #tpu.memory_space<vmem>>, vector<16x256xf32>
    %c6 = arith.constant 6 : index
    %c0_32 = arith.constant 0 : index
    %c0_33 = arith.constant 0 : index
    %45 = vector.load %arg2[%c6, %c0_32, %c0_33] : memref<9x1x256xf32, #tpu.memory_space<vmem>>, vector<1x1x256xf32>
    %46 = vector.shape_cast %45 : vector<1x1x256xf32> to vector<1x256xf32>
    %47 = vector.broadcast %46 : vector<1x256xf32> to vector<16x256xf32>
    %48 = arith.mulf %44, %47 : vector<16x256xf32>
    %49 = arith.truncf %48 : vector<16x256xf32> to vector<16x256xbf16>
    %c96 = arith.constant 96 : index
    %c0_34 = arith.constant 0 : index
    %50 = vector.load %arg15[%c96, %c0_34] : memref<144x256xbf16, #tpu.memory_space<vmem>>, vector<16x256xbf16>
    tpu.vector_store %arg15[%c96, %c0_34], %49 {strides = array<i32>} : memref<144x256xbf16, #tpu.memory_space<vmem>>, vector<16x256xbf16>,
    %c0_35 = arith.constant 0 : index
    %c144 = arith.constant 144 : index
    %51 = vector.load %arg14[%c0_35, %c144] : memref<16x512xf32, #tpu.memory_space<vmem>>, vector<16x256xf32>
    %c7 = arith.constant 7 : index
    %c0_36 = arith.constant 0 : index
    %c0_37 = arith.constant 0 : index
    %52 = vector.load %arg2[%c7, %c0_36, %c0_37] : memref<9x1x256xf32, #tpu.memory_space<vmem>>, vector<1x1x256xf32>
    %53 = vector.shape_cast %52 : vector<1x1x256xf32> to vector<1x256xf32>
    %54 = vector.broadcast %53 : vector<1x256xf32> to vector<16x256xf32>
    %55 = arith.mulf %51, %54 : vector<16x256xf32>
    %56 = arith.truncf %55 : vector<16x256xf32> to vector<16x256xbf16>
    %c112_38 = arith.constant 112 : index
    %c0_39 = arith.constant 0 : index
    %57 = vector.load %arg15[%c112_38, %c0_39] : memref<144x256xbf16, #tpu.memory_space<vmem>>, vector<16x256xbf16>
    tpu.vector_store %arg15[%c112_38, %c0_39], %56 {strides = array<i32>} : memref<144x256xbf16, #tpu.memory_space<vmem>>, vector<16x256xbf16>,
    %c0_40 = arith.constant 0 : index
    %c145 = arith.constant 145 : index
    %58 = vector.load %arg14[%c0_40, %c145] : memref<16x512xf32, #tpu.memory_space<vmem>>, vector<16x256xf32>
    %c8 = arith.constant 8 : index
    %c0_41 = arith.constant 0 : index
    %c0_42 = arith.constant 0 : index
    %59 = vector.load %arg2[%c8, %c0_41, %c0_42] : memref<9x1x256xf32, #tpu.memory_space<vmem>>, vector<1x1x256xf32>
    %60 = vector.shape_cast %59 : vector<1x1x256xf32> to vector<1x256xf32>
    %61 = vector.broadcast %60 : vector<1x256xf32> to vector<16x256xf32>
    %62 = arith.mulf %58, %61 : vector<16x256xf32>
    %63 = arith.truncf %62 : vector<16x256xf32> to vector<16x256xbf16>
    %c128_43 = arith.constant 128 : index
    %c0_44 = arith.constant 0 : index
    %64 = vector.load %arg15[%c128_43, %c0_44] : memref<144x256xbf16, #tpu.memory_space<vmem>>, vector<16x256xbf16>
    tpu.vector_store %arg15[%c128_43, %c0_44], %63 {strides = array<i32>} : memref<144x256xbf16, #tpu.memory_space<vmem>>, vector<16x256xbf16>,
    %c0_45 = arith.constant 0 : index
    %c0_46 = arith.constant 0 : index
    %65 = vector.load %arg3[%c0_45, %c0_46] : memref<16x144xbf16, #tpu.memory_space<vmem>>, vector<16x144xbf16>
    %c0_47 = arith.constant 0 : index
    %c0_48 = arith.constant 0 : index
    %66 = vector.load %arg15[%c0_47, %c0_48] : memref<144x256xbf16, #tpu.memory_space<vmem>>, vector<144x256xbf16>
    %cst_49 = arith.constant dense<0.000000e+00> : vector<16x256xf32>
    %67 = tpu.matmul %65, %66, %cst_49 {dimension_numbers = #tpu.dot_dimension_numbers<[1], [0], [0], [1], [0, 0, 1, 1], [], []>} : vector<16x144xbf16>, vector<144x256xbf16>, vector<16x256xf32> -> vector<16x256xf32>
    %c0_50 = arith.constant 0 : index
    %c0_51 = arith.constant 0 : index
    %68 = vector.load %arg4[%c0_50, %c0_51] : memref<16x1xf32, #tpu.memory_space<vmem>>, vector<16x1xf32>
    %69 = vector.broadcast %68 : vector<16x1xf32> to vector<16x256xf32>
    %70 = arith.addf %67, %69 : vector<16x256xf32>
    %c0_52 = arith.constant 0 : index
    %c0_53 = arith.constant 0 : index
    %c0_54 = arith.constant 0 : index
    %71 = vector.load %arg13[%c0_52, %c0_53, %c0_54] : memref<2x16x256xf32, #tpu.memory_space<vmem>>, vector<1x16x256xf32>
    %72 = vector.shape_cast %71 : vector<1x16x256xf32> to vector<16x256xf32>
    %73 = vector.shape_cast %70 : vector<16x256xf32> to vector<1x16x256xf32>
    tpu.vector_store %arg13[%c0_52, %c0_53, %c0_54], %73 {strides = array<i32>} : memref<2x16x256xf32, #tpu.memory_space<vmem>>, vector<1x16x256xf32>,
    %cst_55 = arith.constant dense<0.000000e+00> : vector<16xf32>
    %74 = vector.multi_reduction <add>, %70, %cst_55 [1] : vector<16x256xf32> to vector<16xf32>
    %75 = vector.shape_cast %74 : vector<16xf32> to vector<16x1xf32>
    %76 = arith.addf %2, %75 : vector<16x1xf32>
    %c1_56 = arith.constant 1 : index
    %c0_57 = arith.constant 0 : index
    %c0_58 = arith.constant 0 : index
    %77 = vector.load %arg1[%c1_56, %c0_57, %c0_58] : memref<2x16x256xf32, #tpu.memory_space<vmem>>, vector<1x16x256xf32>
    %78 = vector.shape_cast %77 : vector<1x16x256xf32> to vector<16x256xf32>
    %c0_59 = arith.constant 0 : index
    %c128_60 = arith.constant 128 : index
    %79 = vector.load %arg14[%c0_59, %c128_60] : memref<16x512xf32, #tpu.memory_space<vmem>>, vector<16x256xf32>
    tpu.vector_store %arg14[%c0_59, %c128_60], %78 {strides = array<i32>} : memref<16x512xf32, #tpu.memory_space<vmem>>, vector<16x256xf32>,
    %c0_61 = arith.constant 0 : index
    %c111_62 = arith.constant 111 : index
    %80 = vector.load %arg14[%c0_61, %c111_62] : memref<16x512xf32, #tpu.memory_space<vmem>>, vector<16x256xf32>
    %c0_63 = arith.constant 0 : index
    %c0_64 = arith.constant 0 : index
    %c0_65 = arith.constant 0 : index
    %81 = vector.load %arg2[%c0_63, %c0_64, %c0_65] : memref<9x1x256xf32, #tpu.memory_space<vmem>>, vector<1x1x256xf32>
    %82 = vector.shape_cast %81 : vector<1x1x256xf32> to vector<1x256xf32>
    %83 = vector.broadcast %82 : vector<1x256xf32> to vector<16x256xf32>
    %84 = arith.mulf %80, %83 : vector<16x256xf32>
    %85 = arith.truncf %84 : vector<16x256xf32> to vector<16x256xbf16>
    %c0_66 = arith.constant 0 : index
    %c0_67 = arith.constant 0 : index
    %86 = vector.load %arg15[%c0_66, %c0_67] : memref<144x256xbf16, #tpu.memory_space<vmem>>, vector<16x256xbf16>
    tpu.vector_store %arg15[%c0_66, %c0_67], %85 {strides = array<i32>} : memref<144x256xbf16, #tpu.memory_space<vmem>>, vector<16x256xbf16>,
    %c0_68 = arith.constant 0 : index
    %c112_69 = arith.constant 112 : index
    %87 = vector.load %arg14[%c0_68, %c112_69] : memref<16x512xf32, #tpu.memory_space<vmem>>, vector<16x256xf32>
    %c1_70 = arith.constant 1 : index
    %c0_71 = arith.constant 0 : index
    %c0_72 = arith.constant 0 : index
    %88 = vector.load %arg2[%c1_70, %c0_71, %c0_72] : memref<9x1x256xf32, #tpu.memory_space<vmem>>, vector<1x1x256xf32>
    %89 = vector.shape_cast %88 : vector<1x1x256xf32> to vector<1x256xf32>
    %90 = vector.broadcast %89 : vector<1x256xf32> to vector<16x256xf32>
    %91 = arith.mulf %87, %90 : vector<16x256xf32>
    %92 = arith.truncf %91 : vector<16x256xf32> to vector<16x256xbf16>
    %c16_73 = arith.constant 16 : index
    %c0_74 = arith.constant 0 : index
    %93 = vector.load %arg15[%c16_73, %c0_74] : memref<144x256xbf16, #tpu.memory_space<vmem>>, vector<16x256xbf16>
    tpu.vector_store %arg15[%c16_73, %c0_74], %92 {strides = array<i32>} : memref<144x256xbf16, #tpu.memory_space<vmem>>, vector<16x256xbf16>,
    %c0_75 = arith.constant 0 : index
    %c113_76 = arith.constant 113 : index
    %94 = vector.load %arg14[%c0_75, %c113_76] : memref<16x512xf32, #tpu.memory_space<vmem>>, vector<16x256xf32>
    %c2_77 = arith.constant 2 : index
    %c0_78 = arith.constant 0 : index
    %c0_79 = arith.constant 0 : index
    %95 = vector.load %arg2[%c2_77, %c0_78, %c0_79] : memref<9x1x256xf32, #tpu.memory_space<vmem>>, vector<1x1x256xf32>
    %96 = vector.shape_cast %95 : vector<1x1x256xf32> to vector<1x256xf32>
    %97 = vector.broadcast %96 : vector<1x256xf32> to vector<16x256xf32>
    %98 = arith.mulf %94, %97 : vector<16x256xf32>
    %99 = arith.truncf %98 : vector<16x256xf32> to vector<16x256xbf16>
    %c32_80 = arith.constant 32 : index
    %c0_81 = arith.constant 0 : index
    %100 = vector.load %arg15[%c32_80, %c0_81] : memref<144x256xbf16, #tpu.memory_space<vmem>>, vector<16x256xbf16>
    tpu.vector_store %arg15[%c32_80, %c0_81], %99 {strides = array<i32>} : memref<144x256xbf16, #tpu.memory_space<vmem>>, vector<16x256xbf16>,
    %c0_82 = arith.constant 0 : index
    %c127_83 = arith.constant 127 : index
    %101 = vector.load %arg14[%c0_82, %c127_83] : memref<16x512xf32, #tpu.memory_space<vmem>>, vector<16x256xf32>
    %c3_84 = arith.constant 3 : index
    %c0_85 = arith.constant 0 : index
    %c0_86 = arith.constant 0 : index
    %102 = vector.load %arg2[%c3_84, %c0_85, %c0_86] : memref<9x1x256xf32, #tpu.memory_space<vmem>>, vector<1x1x256xf32>
    %103 = vector.shape_cast %102 : vector<1x1x256xf32> to vector<1x256xf32>
    %104 = vector.broadcast %103 : vector<1x256xf32> to vector<16x256xf32>
    %105 = arith.mulf %101, %104 : vector<16x256xf32>
    %106 = arith.truncf %105 : vector<16x256xf32> to vector<16x256xbf16>
    %c48_87 = arith.constant 48 : index
    %c0_88 = arith.constant 0 : index
    %107 = vector.load %arg15[%c48_87, %c0_88] : memref<144x256xbf16, #tpu.memory_space<vmem>>, vector<16x256xbf16>
    tpu.vector_store %arg15[%c48_87, %c0_88], %106 {strides = array<i32>} : memref<144x256xbf16, #tpu.memory_space<vmem>>, vector<16x256xbf16>,
    %c0_89 = arith.constant 0 : index
    %c128_90 = arith.constant 128 : index
    %108 = vector.load %arg14[%c0_89, %c128_90] : memref<16x512xf32, #tpu.memory_space<vmem>>, vector<16x256xf32>
    %109 = arith.truncf %108 : vector<16x256xf32> to vector<16x256xbf16>
    %c64_91 = arith.constant 64 : index
    %c0_92 = arith.constant 0 : index
    %110 = vector.load %arg15[%c64_91, %c0_92] : memref<144x256xbf16, #tpu.memory_space<vmem>>, vector<16x256xbf16>
    tpu.vector_store %arg15[%c64_91, %c0_92], %109 {strides = array<i32>} : memref<144x256xbf16, #tpu.memory_space<vmem>>, vector<16x256xbf16>,
    %c0_93 = arith.constant 0 : index
    %c129_94 = arith.constant 129 : index
    %111 = vector.load %arg14[%c0_93, %c129_94] : memref<16x512xf32, #tpu.memory_space<vmem>>, vector<16x256xf32>
    %c5_95 = arith.constant 5 : index
    %c0_96 = arith.constant 0 : index
    %c0_97 = arith.constant 0 : index
    %112 = vector.load %arg2[%c5_95, %c0_96, %c0_97] : memref<9x1x256xf32, #tpu.memory_space<vmem>>, vector<1x1x256xf32>
    %113 = vector.shape_cast %112 : vector<1x1x256xf32> to vector<1x256xf32>
    %114 = vector.broadcast %113 : vector<1x256xf32> to vector<16x256xf32>
    %115 = arith.mulf %111, %114 : vector<16x256xf32>
    %116 = arith.truncf %115 : vector<16x256xf32> to vector<16x256xbf16>
    %c80_98 = arith.constant 80 : index
    %c0_99 = arith.constant 0 : index
    %117 = vector.load %arg15[%c80_98, %c0_99] : memref<144x256xbf16, #tpu.memory_space<vmem>>, vector<16x256xbf16>
    tpu.vector_store %arg15[%c80_98, %c0_99], %116 {strides = array<i32>} : memref<144x256xbf16, #tpu.memory_space<vmem>>, vector<16x256xbf16>,
    %c0_100 = arith.constant 0 : index
    %c143_101 = arith.constant 143 : index
    %118 = vector.load %arg14[%c0_100, %c143_101] : memref<16x512xf32, #tpu.memory_space<vmem>>, vector<16x256xf32>
    %c6_102 = arith.constant 6 : index
    %c0_103 = arith.constant 0 : index
    %c0_104 = arith.constant 0 : index
    %119 = vector.load %arg2[%c6_102, %c0_103, %c0_104] : memref<9x1x256xf32, #tpu.memory_space<vmem>>, vector<1x1x256xf32>
    %120 = vector.shape_cast %119 : vector<1x1x256xf32> to vector<1x256xf32>
    %121 = vector.broadcast %120 : vector<1x256xf32> to vector<16x256xf32>
    %122 = arith.mulf %118, %121 : vector<16x256xf32>
    %123 = arith.truncf %122 : vector<16x256xf32> to vector<16x256xbf16>
    %c96_105 = arith.constant 96 : index
    %c0_106 = arith.constant 0 : index
    %124 = vector.load %arg15[%c96_105, %c0_106] : memref<144x256xbf16, #tpu.memory_space<vmem>>, vector<16x256xbf16>
    tpu.vector_store %arg15[%c96_105, %c0_106], %123 {strides = array<i32>} : memref<144x256xbf16, #tpu.memory_space<vmem>>, vector<16x256xbf16>,
    %c0_107 = arith.constant 0 : index
    %c144_108 = arith.constant 144 : index
    %125 = vector.load %arg14[%c0_107, %c144_108] : memref<16x512xf32, #tpu.memory_space<vmem>>, vector<16x256xf32>
    %c7_109 = arith.constant 7 : index
    %c0_110 = arith.constant 0 : index
    %c0_111 = arith.constant 0 : index
    %126 = vector.load %arg2[%c7_109, %c0_110, %c0_111] : memref<9x1x256xf32, #tpu.memory_space<vmem>>, vector<1x1x256xf32>
    %127 = vector.shape_cast %126 : vector<1x1x256xf32> to vector<1x256xf32>
    %128 = vector.broadcast %127 : vector<1x256xf32> to vector<16x256xf32>
    %129 = arith.mulf %125, %128 : vector<16x256xf32>
    %130 = arith.truncf %129 : vector<16x256xf32> to vector<16x256xbf16>
    %c112_112 = arith.constant 112 : index
    %c0_113 = arith.constant 0 : index
    %131 = vector.load %arg15[%c112_112, %c0_113] : memref<144x256xbf16, #tpu.memory_space<vmem>>, vector<16x256xbf16>
    tpu.vector_store %arg15[%c112_112, %c0_113], %130 {strides = array<i32>} : memref<144x256xbf16, #tpu.memory_space<vmem>>, vector<16x256xbf16>,
    %c0_114 = arith.constant 0 : index
    %c145_115 = arith.constant 145 : index
    %132 = vector.load %arg14[%c0_114, %c145_115] : memref<16x512xf32, #tpu.memory_space<vmem>>, vector<16x256xf32>
    %c8_116 = arith.constant 8 : index
    %c0_117 = arith.constant 0 : index
    %c0_118 = arith.constant 0 : index
    %133 = vector.load %arg2[%c8_116, %c0_117, %c0_118] : memref<9x1x256xf32, #tpu.memory_space<vmem>>, vector<1x1x256xf32>
    %134 = vector.shape_cast %133 : vector<1x1x256xf32> to vector<1x256xf32>
    %135 = vector.broadcast %134 : vector<1x256xf32> to vector<16x256xf32>
    %136 = arith.mulf %132, %135 : vector<16x256xf32>
    %137 = arith.truncf %136 : vector<16x256xf32> to vector<16x256xbf16>
    %c128_119 = arith.constant 128 : index
    %c0_120 = arith.constant 0 : index
    %138 = vector.load %arg15[%c128_119, %c0_120] : memref<144x256xbf16, #tpu.memory_space<vmem>>, vector<16x256xbf16>
    tpu.vector_store %arg15[%c128_119, %c0_120], %137 {strides = array<i32>} : memref<144x256xbf16, #tpu.memory_space<vmem>>, vector<16x256xbf16>,
    %c0_121 = arith.constant 0 : index
    %c0_122 = arith.constant 0 : index
    %139 = vector.load %arg3[%c0_121, %c0_122] : memref<16x144xbf16, #tpu.memory_space<vmem>>, vector<16x144xbf16>
    %c0_123 = arith.constant 0 : index
    %c0_124 = arith.constant 0 : index
    %140 = vector.load %arg15[%c0_123, %c0_124] : memref<144x256xbf16, #tpu.memory_space<vmem>>, vector<144x256xbf16>
    %cst_125 = arith.constant dense<0.000000e+00> : vector<16x256xf32>
    %141 = tpu.matmul %139, %140, %cst_125 {dimension_numbers = #tpu.dot_dimension_numbers<[1], [0], [0], [1], [0, 0, 1, 1], [], []>} : vector<16x144xbf16>, vector<144x256xbf16>, vector<16x256xf32> -> vector<16x256xf32>
    %c0_126 = arith.constant 0 : index
    %c0_127 = arith.constant 0 : index
    %142 = vector.load %arg4[%c0_126, %c0_127] : memref<16x1xf32, #tpu.memory_space<vmem>>, vector<16x1xf32>
    %143 = vector.broadcast %142 : vector<16x1xf32> to vector<16x256xf32>
    %144 = arith.addf %141, %143 : vector<16x256xf32>
    %c1_128 = arith.constant 1 : index
    %c0_129 = arith.constant 0 : index
    %c0_130 = arith.constant 0 : index
    %145 = vector.load %arg13[%c1_128, %c0_129, %c0_130] : memref<2x16x256xf32, #tpu.memory_space<vmem>>, vector<1x16x256xf32>
    %146 = vector.shape_cast %145 : vector<1x16x256xf32> to vector<16x256xf32>
    %147 = vector.shape_cast %144 : vector<16x256xf32> to vector<1x16x256xf32>
    tpu.vector_store %arg13[%c1_128, %c0_129, %c0_130], %147 {strides = array<i32>} : memref<2x16x256xf32, #tpu.memory_space<vmem>>, vector<1x16x256xf32>,
    %cst_131 = arith.constant dense<0.000000e+00> : vector<16xf32>
    %148 = vector.multi_reduction <add>, %144, %cst_131 [1] : vector<16x256xf32> to vector<16xf32>
    %149 = vector.shape_cast %148 : vector<16xf32> to vector<16x1xf32>
    %150 = arith.addf %76, %149 : vector<16x1xf32>
    %cst_132 = arith.constant 0.001953125 : f32
    %151 = vector.broadcast %cst_132 : f32 to vector<16x1xf32>
    %152 = arith.mulf %150, %151 : vector<16x1xf32>
    %cst_133 = arith.constant 0.000000e+00 : f32
    %153 = vector.broadcast %cst_133 : f32 to vector<16x1xf32>
    %c0_134 = arith.constant 0 : index
    %c0_135 = arith.constant 0 : index
    %c0_136 = arith.constant 0 : index
    %154 = vector.load %arg13[%c0_134, %c0_135, %c0_136] : memref<2x16x256xf32, #tpu.memory_space<vmem>>, vector<1x16x256xf32>
    %155 = vector.shape_cast %154 : vector<1x16x256xf32> to vector<16x256xf32>
    %156 = vector.broadcast %152 : vector<16x1xf32> to vector<16x256xf32>
    %157 = arith.subf %155, %156 : vector<16x256xf32>
    %158 = arith.mulf %157, %157 : vector<16x256xf32>
    %cst_137 = arith.constant dense<0.000000e+00> : vector<16xf32>
    %159 = vector.multi_reduction <add>, %158, %cst_137 [1] : vector<16x256xf32> to vector<16xf32>
    %160 = vector.shape_cast %159 : vector<16xf32> to vector<16x1xf32>
    %161 = arith.addf %153, %160 : vector<16x1xf32>
    %c1_138 = arith.constant 1 : index
    %c0_139 = arith.constant 0 : index
    %c0_140 = arith.constant 0 : index
    %162 = vector.load %arg13[%c1_138, %c0_139, %c0_140] : memref<2x16x256xf32, #tpu.memory_space<vmem>>, vector<1x16x256xf32>
    %163 = vector.shape_cast %162 : vector<1x16x256xf32> to vector<16x256xf32>
    %164 = vector.broadcast %152 : vector<16x1xf32> to vector<16x256xf32>
    %165 = arith.subf %163, %164 : vector<16x256xf32>
    %166 = arith.mulf %165, %165 : vector<16x256xf32>
    %cst_141 = arith.constant dense<0.000000e+00> : vector<16xf32>
    %167 = vector.multi_reduction <add>, %166, %cst_141 [1] : vector<16x256xf32> to vector<16xf32>
    %168 = vector.shape_cast %167 : vector<16xf32> to vector<16x1xf32>
    %169 = arith.addf %161, %168 : vector<16x1xf32>
    %c0_142 = arith.constant 0 : index
    %c0_143 = arith.constant 0 : index
    %170 = vector.load %arg5[%c0_142, %c0_143] : memref<16x1xf32, #tpu.memory_space<vmem>>, vector<16x1xf32>
    %cst_144 = arith.constant 0.001953125 : f32
    %171 = vector.broadcast %cst_144 : f32 to vector<16x1xf32>
    %172 = arith.mulf %169, %171 : vector<16x1xf32>
    %cst_145 = arith.constant 9.99999974E-6 : f32
    %173 = vector.broadcast %cst_145 : f32 to vector<16x1xf32>
    %174 = arith.addf %172, %173 : vector<16x1xf32>
    %175 = math.rsqrt %174 : vector<16x1xf32>
    %176 = arith.mulf %170, %175 : vector<16x1xf32>
    %c0_146 = arith.constant 0 : index
    %c0_147 = arith.constant 0 : index
    %177 = vector.load %arg6[%c0_146, %c0_147] : memref<16x1xf32, #tpu.memory_space<vmem>>, vector<16x1xf32>
    %178 = arith.mulf %152, %176 : vector<16x1xf32>
    %179 = arith.subf %177, %178 : vector<16x1xf32>
    %cst_148 = arith.constant 0.000000e+00 : f32
    %180 = vector.broadcast %cst_148 : f32 to vector<16x1xf32>
    %c0_149 = arith.constant 0 : index
    %c0_150 = arith.constant 0 : index
    %c0_151 = arith.constant 0 : index
    %181 = vector.load %arg13[%c0_149, %c0_150, %c0_151] : memref<2x16x256xf32, #tpu.memory_space<vmem>>, vector<1x16x256xf32>
    %182 = vector.shape_cast %181 : vector<1x16x256xf32> to vector<16x256xf32>
    %183 = vector.broadcast %176 : vector<16x1xf32> to vector<16x256xf32>
    %184 = arith.mulf %182, %183 : vector<16x256xf32>
    %185 = vector.broadcast %179 : vector<16x1xf32> to vector<16x256xf32>
    %186 = arith.addf %184, %185 : vector<16x256xf32>
    %cst_152 = arith.constant 0.000000e+00 : f32
    %187 = vector.broadcast %cst_152 : f32 to vector<16x256xf32>
    %188 = arith.cmpf oge, %186, %187 : vector<16x256xf32>
    %c0_153 = arith.constant 0 : index
    %c0_154 = arith.constant 0 : index
    %189 = vector.load %arg7[%c0_153, %c0_154] : memref<1x1xf32, #tpu.memory_space<vmem>>, vector<1x1xf32>
    %190 = vector.broadcast %189 : vector<1x1xf32> to vector<16x256xf32>
    %191 = arith.mulf %190, %186 : vector<16x256xf32>
    %192 = arith.select %188, %186, %191 : vector<16x256xi1>, vector<16x256xf32>
    %c0_155 = arith.constant 0 : index
    %c128_156 = arith.constant 128 : index
    %193 = vector.load %arg14[%c0_155, %c128_156] : memref<16x512xf32, #tpu.memory_space<vmem>>, vector<16x256xf32>
    tpu.vector_store %arg14[%c0_155, %c128_156], %192 {strides = array<i32>} : memref<16x512xf32, #tpu.memory_space<vmem>>, vector<16x256xf32>,
    %c0_157 = arith.constant 0 : index
    %c111_158 = arith.constant 111 : index
    %194 = vector.load %arg14[%c0_157, %c111_158] : memref<16x512xf32, #tpu.memory_space<vmem>>, vector<16x256xf32>
    %c0_159 = arith.constant 0 : index
    %c0_160 = arith.constant 0 : index
    %c0_161 = arith.constant 0 : index
    %195 = vector.load %arg2[%c0_159, %c0_160, %c0_161] : memref<9x1x256xf32, #tpu.memory_space<vmem>>, vector<1x1x256xf32>
    %196 = vector.shape_cast %195 : vector<1x1x256xf32> to vector<1x256xf32>
    %197 = vector.broadcast %196 : vector<1x256xf32> to vector<16x256xf32>
    %198 = arith.mulf %194, %197 : vector<16x256xf32>
    %199 = arith.truncf %198 : vector<16x256xf32> to vector<16x256xbf16>
    %c0_162 = arith.constant 0 : index
    %c0_163 = arith.constant 0 : index
    %200 = vector.load %arg15[%c0_162, %c0_163] : memref<144x256xbf16, #tpu.memory_space<vmem>>, vector<16x256xbf16>
    tpu.vector_store %arg15[%c0_162, %c0_163], %199 {strides = array<i32>} : memref<144x256xbf16, #tpu.memory_space<vmem>>, vector<16x256xbf16>,
    %c0_164 = arith.constant 0 : index
    %c112_165 = arith.constant 112 : index
    %201 = vector.load %arg14[%c0_164, %c112_165] : memref<16x512xf32, #tpu.memory_space<vmem>>, vector<16x256xf32>
    %c1_166 = arith.constant 1 : index
    %c0_167 = arith.constant 0 : index
    %c0_168 = arith.constant 0 : index
    %202 = vector.load %arg2[%c1_166, %c0_167, %c0_168] : memref<9x1x256xf32, #tpu.memory_space<vmem>>, vector<1x1x256xf32>
    %203 = vector.shape_cast %202 : vector<1x1x256xf32> to vector<1x256xf32>
    %204 = vector.broadcast %203 : vector<1x256xf32> to vector<16x256xf32>
    %205 = arith.mulf %201, %204 : vector<16x256xf32>
    %206 = arith.truncf %205 : vector<16x256xf32> to vector<16x256xbf16>
    %c16_169 = arith.constant 16 : index
    %c0_170 = arith.constant 0 : index
    %207 = vector.load %arg15[%c16_169, %c0_170] : memref<144x256xbf16, #tpu.memory_space<vmem>>, vector<16x256xbf16>
    tpu.vector_store %arg15[%c16_169, %c0_170], %206 {strides = array<i32>} : memref<144x256xbf16, #tpu.memory_space<vmem>>, vector<16x256xbf16>,
    %c0_171 = arith.constant 0 : index
    %c113_172 = arith.constant 113 : index
    %208 = vector.load %arg14[%c0_171, %c113_172] : memref<16x512xf32, #tpu.memory_space<vmem>>, vector<16x256xf32>
    %c2_173 = arith.constant 2 : index
    %c0_174 = arith.constant 0 : index
    %c0_175 = arith.constant 0 : index
    %209 = vector.load %arg2[%c2_173, %c0_174, %c0_175] : memref<9x1x256xf32, #tpu.memory_space<vmem>>, vector<1x1x256xf32>
    %210 = vector.shape_cast %209 : vector<1x1x256xf32> to vector<1x256xf32>
    %211 = vector.broadcast %210 : vector<1x256xf32> to vector<16x256xf32>
    %212 = arith.mulf %208, %211 : vector<16x256xf32>
    %213 = arith.truncf %212 : vector<16x256xf32> to vector<16x256xbf16>
    %c32_176 = arith.constant 32 : index
    %c0_177 = arith.constant 0 : index
    %214 = vector.load %arg15[%c32_176, %c0_177] : memref<144x256xbf16, #tpu.memory_space<vmem>>, vector<16x256xbf16>
    tpu.vector_store %arg15[%c32_176, %c0_177], %213 {strides = array<i32>} : memref<144x256xbf16, #tpu.memory_space<vmem>>, vector<16x256xbf16>,
    %c0_178 = arith.constant 0 : index
    %c127_179 = arith.constant 127 : index
    %215 = vector.load %arg14[%c0_178, %c127_179] : memref<16x512xf32, #tpu.memory_space<vmem>>, vector<16x256xf32>
    %c3_180 = arith.constant 3 : index
    %c0_181 = arith.constant 0 : index
    %c0_182 = arith.constant 0 : index
    %216 = vector.load %arg2[%c3_180, %c0_181, %c0_182] : memref<9x1x256xf32, #tpu.memory_space<vmem>>, vector<1x1x256xf32>
    %217 = vector.shape_cast %216 : vector<1x1x256xf32> to vector<1x256xf32>
    %218 = vector.broadcast %217 : vector<1x256xf32> to vector<16x256xf32>
    %219 = arith.mulf %215, %218 : vector<16x256xf32>
    %220 = arith.truncf %219 : vector<16x256xf32> to vector<16x256xbf16>
    %c48_183 = arith.constant 48 : index
    %c0_184 = arith.constant 0 : index
    %221 = vector.load %arg15[%c48_183, %c0_184] : memref<144x256xbf16, #tpu.memory_space<vmem>>, vector<16x256xbf16>
    tpu.vector_store %arg15[%c48_183, %c0_184], %220 {strides = array<i32>} : memref<144x256xbf16, #tpu.memory_space<vmem>>, vector<16x256xbf16>,
    %c0_185 = arith.constant 0 : index
    %c128_186 = arith.constant 128 : index
    %222 = vector.load %arg14[%c0_185, %c128_186] : memref<16x512xf32, #tpu.memory_space<vmem>>, vector<16x256xf32>
    %223 = arith.truncf %222 : vector<16x256xf32> to vector<16x256xbf16>
    %c64_187 = arith.constant 64 : index
    %c0_188 = arith.constant 0 : index
    %224 = vector.load %arg15[%c64_187, %c0_188] : memref<144x256xbf16, #tpu.memory_space<vmem>>, vector<16x256xbf16>
    tpu.vector_store %arg15[%c64_187, %c0_188], %223 {strides = array<i32>} : memref<144x256xbf16, #tpu.memory_space<vmem>>, vector<16x256xbf16>,
    %c0_189 = arith.constant 0 : index
    %c129_190 = arith.constant 129 : index
    %225 = vector.load %arg14[%c0_189, %c129_190] : memref<16x512xf32, #tpu.memory_space<vmem>>, vector<16x256xf32>
    %c5_191 = arith.constant 5 : index
    %c0_192 = arith.constant 0 : index
    %c0_193 = arith.constant 0 : index
    %226 = vector.load %arg2[%c5_191, %c0_192, %c0_193] : memref<9x1x256xf32, #tpu.memory_space<vmem>>, vector<1x1x256xf32>
    %227 = vector.shape_cast %226 : vector<1x1x256xf32> to vector<1x256xf32>
    %228 = vector.broadcast %227 : vector<1x256xf32> to vector<16x256xf32>
    %229 = arith.mulf %225, %228 : vector<16x256xf32>
    %230 = arith.truncf %229 : vector<16x256xf32> to vector<16x256xbf16>
    %c80_194 = arith.constant 80 : index
    %c0_195 = arith.constant 0 : index
    %231 = vector.load %arg15[%c80_194, %c0_195] : memref<144x256xbf16, #tpu.memory_space<vmem>>, vector<16x256xbf16>
    tpu.vector_store %arg15[%c80_194, %c0_195], %230 {strides = array<i32>} : memref<144x256xbf16, #tpu.memory_space<vmem>>, vector<16x256xbf16>,
    %c0_196 = arith.constant 0 : index
    %c143_197 = arith.constant 143 : index
    %232 = vector.load %arg14[%c0_196, %c143_197] : memref<16x512xf32, #tpu.memory_space<vmem>>, vector<16x256xf32>
    %c6_198 = arith.constant 6 : index
    %c0_199 = arith.constant 0 : index
    %c0_200 = arith.constant 0 : index
    %233 = vector.load %arg2[%c6_198, %c0_199, %c0_200] : memref<9x1x256xf32, #tpu.memory_space<vmem>>, vector<1x1x256xf32>
    %234 = vector.shape_cast %233 : vector<1x1x256xf32> to vector<1x256xf32>
    %235 = vector.broadcast %234 : vector<1x256xf32> to vector<16x256xf32>
    %236 = arith.mulf %232, %235 : vector<16x256xf32>
    %237 = arith.truncf %236 : vector<16x256xf32> to vector<16x256xbf16>
    %c96_201 = arith.constant 96 : index
    %c0_202 = arith.constant 0 : index
    %238 = vector.load %arg15[%c96_201, %c0_202] : memref<144x256xbf16, #tpu.memory_space<vmem>>, vector<16x256xbf16>
    tpu.vector_store %arg15[%c96_201, %c0_202], %237 {strides = array<i32>} : memref<144x256xbf16, #tpu.memory_space<vmem>>, vector<16x256xbf16>,
    %c0_203 = arith.constant 0 : index
    %c144_204 = arith.constant 144 : index
    %239 = vector.load %arg14[%c0_203, %c144_204] : memref<16x512xf32, #tpu.memory_space<vmem>>, vector<16x256xf32>
    %c7_205 = arith.constant 7 : index
    %c0_206 = arith.constant 0 : index
    %c0_207 = arith.constant 0 : index
    %240 = vector.load %arg2[%c7_205, %c0_206, %c0_207] : memref<9x1x256xf32, #tpu.memory_space<vmem>>, vector<1x1x256xf32>
    %241 = vector.shape_cast %240 : vector<1x1x256xf32> to vector<1x256xf32>
    %242 = vector.broadcast %241 : vector<1x256xf32> to vector<16x256xf32>
    %243 = arith.mulf %239, %242 : vector<16x256xf32>
    %244 = arith.truncf %243 : vector<16x256xf32> to vector<16x256xbf16>
    %c112_208 = arith.constant 112 : index
    %c0_209 = arith.constant 0 : index
    %245 = vector.load %arg15[%c112_208, %c0_209] : memref<144x256xbf16, #tpu.memory_space<vmem>>, vector<16x256xbf16>
    tpu.vector_store %arg15[%c112_208, %c0_209], %244 {strides = array<i32>} : memref<144x256xbf16, #tpu.memory_space<vmem>>, vector<16x256xbf16>,
    %c0_210 = arith.constant 0 : index
    %c145_211 = arith.constant 145 : index
    %246 = vector.load %arg14[%c0_210, %c145_211] : memref<16x512xf32, #tpu.memory_space<vmem>>, vector<16x256xf32>
    %c8_212 = arith.constant 8 : index
    %c0_213 = arith.constant 0 : index
    %c0_214 = arith.constant 0 : index
    %247 = vector.load %arg2[%c8_212, %c0_213, %c0_214] : memref<9x1x256xf32, #tpu.memory_space<vmem>>, vector<1x1x256xf32>
    %248 = vector.shape_cast %247 : vector<1x1x256xf32> to vector<1x256xf32>
    %249 = vector.broadcast %248 : vector<1x256xf32> to vector<16x256xf32>
    %250 = arith.mulf %246, %249 : vector<16x256xf32>
    %251 = arith.truncf %250 : vector<16x256xf32> to vector<16x256xbf16>
    %c128_215 = arith.constant 128 : index
    %c0_216 = arith.constant 0 : index
    %252 = vector.load %arg15[%c128_215, %c0_216] : memref<144x256xbf16, #tpu.memory_space<vmem>>, vector<16x256xbf16>
    tpu.vector_store %arg15[%c128_215, %c0_216], %251 {strides = array<i32>} : memref<144x256xbf16, #tpu.memory_space<vmem>>, vector<16x256xbf16>,
    %c0_217 = arith.constant 0 : index
    %c0_218 = arith.constant 0 : index
    %253 = vector.load %arg8[%c0_217, %c0_218] : memref<16x144xbf16, #tpu.memory_space<vmem>>, vector<16x144xbf16>
    %c0_219 = arith.constant 0 : index
    %c0_220 = arith.constant 0 : index
    %254 = vector.load %arg15[%c0_219, %c0_220] : memref<144x256xbf16, #tpu.memory_space<vmem>>, vector<144x256xbf16>
    %cst_221 = arith.constant dense<0.000000e+00> : vector<16x256xf32>
    %255 = tpu.matmul %253, %254, %cst_221 {dimension_numbers = #tpu.dot_dimension_numbers<[1], [0], [0], [1], [0, 0, 1, 1], [], []>} : vector<16x144xbf16>, vector<144x256xbf16>, vector<16x256xf32> -> vector<16x256xf32>
    %c0_222 = arith.constant 0 : index
    %c0_223 = arith.constant 0 : index
    %256 = vector.load %arg9[%c0_222, %c0_223] : memref<16x1xf32, #tpu.memory_space<vmem>>, vector<16x1xf32>
    %257 = vector.broadcast %256 : vector<16x1xf32> to vector<16x256xf32>
    %258 = arith.addf %255, %257 : vector<16x256xf32>
    %c0_224 = arith.constant 0 : index
    %c0_225 = arith.constant 0 : index
    %c0_226 = arith.constant 0 : index
    %259 = vector.load %arg12[%c0_224, %c0_225, %c0_226] : memref<2x16x256xf32, #tpu.memory_space<vmem>>, vector<1x16x256xf32>
    %260 = vector.shape_cast %259 : vector<1x16x256xf32> to vector<16x256xf32>
    %261 = vector.shape_cast %258 : vector<16x256xf32> to vector<1x16x256xf32>
    tpu.vector_store %arg12[%c0_224, %c0_225, %c0_226], %261 {strides = array<i32>} : memref<2x16x256xf32, #tpu.memory_space<vmem>>, vector<1x16x256xf32>,
    %cst_227 = arith.constant dense<0.000000e+00> : vector<16xf32>
    %262 = vector.multi_reduction <add>, %258, %cst_227 [1] : vector<16x256xf32> to vector<16xf32>
    %263 = vector.shape_cast %262 : vector<16xf32> to vector<16x1xf32>
    %264 = arith.addf %180, %263 : vector<16x1xf32>
    %c1_228 = arith.constant 1 : index
    %c0_229 = arith.constant 0 : index
    %c0_230 = arith.constant 0 : index
    %265 = vector.load %arg13[%c1_228, %c0_229, %c0_230] : memref<2x16x256xf32, #tpu.memory_space<vmem>>, vector<1x16x256xf32>
    %266 = vector.shape_cast %265 : vector<1x16x256xf32> to vector<16x256xf32>
    %267 = vector.broadcast %176 : vector<16x1xf32> to vector<16x256xf32>
    %268 = arith.mulf %266, %267 : vector<16x256xf32>
    %269 = vector.broadcast %179 : vector<16x1xf32> to vector<16x256xf32>
    %270 = arith.addf %268, %269 : vector<16x256xf32>
    %cst_231 = arith.constant 0.000000e+00 : f32
    %271 = vector.broadcast %cst_231 : f32 to vector<16x256xf32>
    %272 = arith.cmpf oge, %270, %271 : vector<16x256xf32>
    %c0_232 = arith.constant 0 : index
    %c0_233 = arith.constant 0 : index
    %273 = vector.load %arg7[%c0_232, %c0_233] : memref<1x1xf32, #tpu.memory_space<vmem>>, vector<1x1xf32>
    %274 = vector.broadcast %273 : vector<1x1xf32> to vector<16x256xf32>
    %275 = arith.mulf %274, %270 : vector<16x256xf32>
    %276 = arith.select %272, %270, %275 : vector<16x256xi1>, vector<16x256xf32>
    %c0_234 = arith.constant 0 : index
    %c128_235 = arith.constant 128 : index
    %277 = vector.load %arg14[%c0_234, %c128_235] : memref<16x512xf32, #tpu.memory_space<vmem>>, vector<16x256xf32>
    tpu.vector_store %arg14[%c0_234, %c128_235], %276 {strides = array<i32>} : memref<16x512xf32, #tpu.memory_space<vmem>>, vector<16x256xf32>,
    %c0_236 = arith.constant 0 : index
    %c111_237 = arith.constant 111 : index
    %278 = vector.load %arg14[%c0_236, %c111_237] : memref<16x512xf32, #tpu.memory_space<vmem>>, vector<16x256xf32>
    %c0_238 = arith.constant 0 : index
    %c0_239 = arith.constant 0 : index
    %c0_240 = arith.constant 0 : index
    %279 = vector.load %arg2[%c0_238, %c0_239, %c0_240] : memref<9x1x256xf32, #tpu.memory_space<vmem>>, vector<1x1x256xf32>
    %280 = vector.shape_cast %279 : vector<1x1x256xf32> to vector<1x256xf32>
    %281 = vector.broadcast %280 : vector<1x256xf32> to vector<16x256xf32>
    %282 = arith.mulf %278, %281 : vector<16x256xf32>
    %283 = arith.truncf %282 : vector<16x256xf32> to vector<16x256xbf16>
    %c0_241 = arith.constant 0 : index
    %c0_242 = arith.constant 0 : index
    %284 = vector.load %arg15[%c0_241, %c0_242] : memref<144x256xbf16, #tpu.memory_space<vmem>>, vector<16x256xbf16>
    tpu.vector_store %arg15[%c0_241, %c0_242], %283 {strides = array<i32>} : memref<144x256xbf16, #tpu.memory_space<vmem>>, vector<16x256xbf16>,
    %c0_243 = arith.constant 0 : index
    %c112_244 = arith.constant 112 : index
    %285 = vector.load %arg14[%c0_243, %c112_244] : memref<16x512xf32, #tpu.memory_space<vmem>>, vector<16x256xf32>
    %c1_245 = arith.constant 1 : index
    %c0_246 = arith.constant 0 : index
    %c0_247 = arith.constant 0 : index
    %286 = vector.load %arg2[%c1_245, %c0_246, %c0_247] : memref<9x1x256xf32, #tpu.memory_space<vmem>>, vector<1x1x256xf32>
    %287 = vector.shape_cast %286 : vector<1x1x256xf32> to vector<1x256xf32>
    %288 = vector.broadcast %287 : vector<1x256xf32> to vector<16x256xf32>
    %289 = arith.mulf %285, %288 : vector<16x256xf32>
    %290 = arith.truncf %289 : vector<16x256xf32> to vector<16x256xbf16>
    %c16_248 = arith.constant 16 : index
    %c0_249 = arith.constant 0 : index
    %291 = vector.load %arg15[%c16_248, %c0_249] : memref<144x256xbf16, #tpu.memory_space<vmem>>, vector<16x256xbf16>
    tpu.vector_store %arg15[%c16_248, %c0_249], %290 {strides = array<i32>} : memref<144x256xbf16, #tpu.memory_space<vmem>>, vector<16x256xbf16>,
    %c0_250 = arith.constant 0 : index
    %c113_251 = arith.constant 113 : index
    %292 = vector.load %arg14[%c0_250, %c113_251] : memref<16x512xf32, #tpu.memory_space<vmem>>, vector<16x256xf32>
    %c2_252 = arith.constant 2 : index
    %c0_253 = arith.constant 0 : index
    %c0_254 = arith.constant 0 : index
    %293 = vector.load %arg2[%c2_252, %c0_253, %c0_254] : memref<9x1x256xf32, #tpu.memory_space<vmem>>, vector<1x1x256xf32>
    %294 = vector.shape_cast %293 : vector<1x1x256xf32> to vector<1x256xf32>
    %295 = vector.broadcast %294 : vector<1x256xf32> to vector<16x256xf32>
    %296 = arith.mulf %292, %295 : vector<16x256xf32>
    %297 = arith.truncf %296 : vector<16x256xf32> to vector<16x256xbf16>
    %c32_255 = arith.constant 32 : index
    %c0_256 = arith.constant 0 : index
    %298 = vector.load %arg15[%c32_255, %c0_256] : memref<144x256xbf16, #tpu.memory_space<vmem>>, vector<16x256xbf16>
    tpu.vector_store %arg15[%c32_255, %c0_256], %297 {strides = array<i32>} : memref<144x256xbf16, #tpu.memory_space<vmem>>, vector<16x256xbf16>,
    %c0_257 = arith.constant 0 : index
    %c127_258 = arith.constant 127 : index
    %299 = vector.load %arg14[%c0_257, %c127_258] : memref<16x512xf32, #tpu.memory_space<vmem>>, vector<16x256xf32>
    %c3_259 = arith.constant 3 : index
    %c0_260 = arith.constant 0 : index
    %c0_261 = arith.constant 0 : index
    %300 = vector.load %arg2[%c3_259, %c0_260, %c0_261] : memref<9x1x256xf32, #tpu.memory_space<vmem>>, vector<1x1x256xf32>
    %301 = vector.shape_cast %300 : vector<1x1x256xf32> to vector<1x256xf32>
    %302 = vector.broadcast %301 : vector<1x256xf32> to vector<16x256xf32>
    %303 = arith.mulf %299, %302 : vector<16x256xf32>
    %304 = arith.truncf %303 : vector<16x256xf32> to vector<16x256xbf16>
    %c48_262 = arith.constant 48 : index
    %c0_263 = arith.constant 0 : index
    %305 = vector.load %arg15[%c48_262, %c0_263] : memref<144x256xbf16, #tpu.memory_space<vmem>>, vector<16x256xbf16>
    tpu.vector_store %arg15[%c48_262, %c0_263], %304 {strides = array<i32>} : memref<144x256xbf16, #tpu.memory_space<vmem>>, vector<16x256xbf16>,
    %c0_264 = arith.constant 0 : index
    %c128_265 = arith.constant 128 : index
    %306 = vector.load %arg14[%c0_264, %c128_265] : memref<16x512xf32, #tpu.memory_space<vmem>>, vector<16x256xf32>
    %307 = arith.truncf %306 : vector<16x256xf32> to vector<16x256xbf16>
    %c64_266 = arith.constant 64 : index
    %c0_267 = arith.constant 0 : index
    %308 = vector.load %arg15[%c64_266, %c0_267] : memref<144x256xbf16, #tpu.memory_space<vmem>>, vector<16x256xbf16>
    tpu.vector_store %arg15[%c64_266, %c0_267], %307 {strides = array<i32>} : memref<144x256xbf16, #tpu.memory_space<vmem>>, vector<16x256xbf16>,
    %c0_268 = arith.constant 0 : index
    %c129_269 = arith.constant 129 : index
    %309 = vector.load %arg14[%c0_268, %c129_269] : memref<16x512xf32, #tpu.memory_space<vmem>>, vector<16x256xf32>
    %c5_270 = arith.constant 5 : index
    %c0_271 = arith.constant 0 : index
    %c0_272 = arith.constant 0 : index
    %310 = vector.load %arg2[%c5_270, %c0_271, %c0_272] : memref<9x1x256xf32, #tpu.memory_space<vmem>>, vector<1x1x256xf32>
    %311 = vector.shape_cast %310 : vector<1x1x256xf32> to vector<1x256xf32>
    %312 = vector.broadcast %311 : vector<1x256xf32> to vector<16x256xf32>
    %313 = arith.mulf %309, %312 : vector<16x256xf32>
    %314 = arith.truncf %313 : vector<16x256xf32> to vector<16x256xbf16>
    %c80_273 = arith.constant 80 : index
    %c0_274 = arith.constant 0 : index
    %315 = vector.load %arg15[%c80_273, %c0_274] : memref<144x256xbf16, #tpu.memory_space<vmem>>, vector<16x256xbf16>
    tpu.vector_store %arg15[%c80_273, %c0_274], %314 {strides = array<i32>} : memref<144x256xbf16, #tpu.memory_space<vmem>>, vector<16x256xbf16>,
    %c0_275 = arith.constant 0 : index
    %c143_276 = arith.constant 143 : index
    %316 = vector.load %arg14[%c0_275, %c143_276] : memref<16x512xf32, #tpu.memory_space<vmem>>, vector<16x256xf32>
    %c6_277 = arith.constant 6 : index
    %c0_278 = arith.constant 0 : index
    %c0_279 = arith.constant 0 : index
    %317 = vector.load %arg2[%c6_277, %c0_278, %c0_279] : memref<9x1x256xf32, #tpu.memory_space<vmem>>, vector<1x1x256xf32>
    %318 = vector.shape_cast %317 : vector<1x1x256xf32> to vector<1x256xf32>
    %319 = vector.broadcast %318 : vector<1x256xf32> to vector<16x256xf32>
    %320 = arith.mulf %316, %319 : vector<16x256xf32>
    %321 = arith.truncf %320 : vector<16x256xf32> to vector<16x256xbf16>
    %c96_280 = arith.constant 96 : index
    %c0_281 = arith.constant 0 : index
    %322 = vector.load %arg15[%c96_280, %c0_281] : memref<144x256xbf16, #tpu.memory_space<vmem>>, vector<16x256xbf16>
    tpu.vector_store %arg15[%c96_280, %c0_281], %321 {strides = array<i32>} : memref<144x256xbf16, #tpu.memory_space<vmem>>, vector<16x256xbf16>,
    %c0_282 = arith.constant 0 : index
    %c144_283 = arith.constant 144 : index
    %323 = vector.load %arg14[%c0_282, %c144_283] : memref<16x512xf32, #tpu.memory_space<vmem>>, vector<16x256xf32>
    %c7_284 = arith.constant 7 : index
    %c0_285 = arith.constant 0 : index
    %c0_286 = arith.constant 0 : index
    %324 = vector.load %arg2[%c7_284, %c0_285, %c0_286] : memref<9x1x256xf32, #tpu.memory_space<vmem>>, vector<1x1x256xf32>
    %325 = vector.shape_cast %324 : vector<1x1x256xf32> to vector<1x256xf32>
    %326 = vector.broadcast %325 : vector<1x256xf32> to vector<16x256xf32>
    %327 = arith.mulf %323, %326 : vector<16x256xf32>
    %328 = arith.truncf %327 : vector<16x256xf32> to vector<16x256xbf16>
    %c112_287 = arith.constant 112 : index
    %c0_288 = arith.constant 0 : index
    %329 = vector.load %arg15[%c112_287, %c0_288] : memref<144x256xbf16, #tpu.memory_space<vmem>>, vector<16x256xbf16>
    tpu.vector_store %arg15[%c112_287, %c0_288], %328 {strides = array<i32>} : memref<144x256xbf16, #tpu.memory_space<vmem>>, vector<16x256xbf16>,
    %c0_289 = arith.constant 0 : index
    %c145_290 = arith.constant 145 : index
    %330 = vector.load %arg14[%c0_289, %c145_290] : memref<16x512xf32, #tpu.memory_space<vmem>>, vector<16x256xf32>
    %c8_291 = arith.constant 8 : index
    %c0_292 = arith.constant 0 : index
    %c0_293 = arith.constant 0 : index
    %331 = vector.load %arg2[%c8_291, %c0_292, %c0_293] : memref<9x1x256xf32, #tpu.memory_space<vmem>>, vector<1x1x256xf32>
    %332 = vector.shape_cast %331 : vector<1x1x256xf32> to vector<1x256xf32>
    %333 = vector.broadcast %332 : vector<1x256xf32> to vector<16x256xf32>
    %334 = arith.mulf %330, %333 : vector<16x256xf32>
    %335 = arith.truncf %334 : vector<16x256xf32> to vector<16x256xbf16>
    %c128_294 = arith.constant 128 : index
    %c0_295 = arith.constant 0 : index
    %336 = vector.load %arg15[%c128_294, %c0_295] : memref<144x256xbf16, #tpu.memory_space<vmem>>, vector<16x256xbf16>
    tpu.vector_store %arg15[%c128_294, %c0_295], %335 {strides = array<i32>} : memref<144x256xbf16, #tpu.memory_space<vmem>>, vector<16x256xbf16>,
    %c0_296 = arith.constant 0 : index
    %c0_297 = arith.constant 0 : index
    %337 = vector.load %arg8[%c0_296, %c0_297] : memref<16x144xbf16, #tpu.memory_space<vmem>>, vector<16x144xbf16>
    %c0_298 = arith.constant 0 : index
    %c0_299 = arith.constant 0 : index
    %338 = vector.load %arg15[%c0_298, %c0_299] : memref<144x256xbf16, #tpu.memory_space<vmem>>, vector<144x256xbf16>
    %cst_300 = arith.constant dense<0.000000e+00> : vector<16x256xf32>
    %339 = tpu.matmul %337, %338, %cst_300 {dimension_numbers = #tpu.dot_dimension_numbers<[1], [0], [0], [1], [0, 0, 1, 1], [], []>} : vector<16x144xbf16>, vector<144x256xbf16>, vector<16x256xf32> -> vector<16x256xf32>
    %c0_301 = arith.constant 0 : index
    %c0_302 = arith.constant 0 : index
    %340 = vector.load %arg9[%c0_301, %c0_302] : memref<16x1xf32, #tpu.memory_space<vmem>>, vector<16x1xf32>
    %341 = vector.broadcast %340 : vector<16x1xf32> to vector<16x256xf32>
    %342 = arith.addf %339, %341 : vector<16x256xf32>
    %c1_303 = arith.constant 1 : index
    %c0_304 = arith.constant 0 : index
    %c0_305 = arith.constant 0 : index
    %343 = vector.load %arg12[%c1_303, %c0_304, %c0_305] : memref<2x16x256xf32, #tpu.memory_space<vmem>>, vector<1x16x256xf32>
    %344 = vector.shape_cast %343 : vector<1x16x256xf32> to vector<16x256xf32>
    %345 = vector.shape_cast %342 : vector<16x256xf32> to vector<1x16x256xf32>
    tpu.vector_store %arg12[%c1_303, %c0_304, %c0_305], %345 {strides = array<i32>} : memref<2x16x256xf32, #tpu.memory_space<vmem>>, vector<1x16x256xf32>,
    %cst_306 = arith.constant dense<0.000000e+00> : vector<16xf32>
    %346 = vector.multi_reduction <add>, %342, %cst_306 [1] : vector<16x256xf32> to vector<16xf32>
    %347 = vector.shape_cast %346 : vector<16xf32> to vector<16x1xf32>
    %348 = arith.addf %264, %347 : vector<16x1xf32>
    %cst_307 = arith.constant 0.001953125 : f32
    %349 = vector.broadcast %cst_307 : f32 to vector<16x1xf32>
    %350 = arith.mulf %348, %349 : vector<16x1xf32>
    %cst_308 = arith.constant 0.000000e+00 : f32
    %351 = vector.broadcast %cst_308 : f32 to vector<16x1xf32>
    %c0_309 = arith.constant 0 : index
    %c0_310 = arith.constant 0 : index
    %c0_311 = arith.constant 0 : index
    %352 = vector.load %arg12[%c0_309, %c0_310, %c0_311] : memref<2x16x256xf32, #tpu.memory_space<vmem>>, vector<1x16x256xf32>
    %353 = vector.shape_cast %352 : vector<1x16x256xf32> to vector<16x256xf32>
    %354 = vector.broadcast %350 : vector<16x1xf32> to vector<16x256xf32>
    %355 = arith.subf %353, %354 : vector<16x256xf32>
    %356 = arith.mulf %355, %355 : vector<16x256xf32>
    %cst_312 = arith.constant dense<0.000000e+00> : vector<16xf32>
    %357 = vector.multi_reduction <add>, %356, %cst_312 [1] : vector<16x256xf32> to vector<16xf32>
    %358 = vector.shape_cast %357 : vector<16xf32> to vector<16x1xf32>
    %359 = arith.addf %351, %358 : vector<16x1xf32>
    %c1_313 = arith.constant 1 : index
    %c0_314 = arith.constant 0 : index
    %c0_315 = arith.constant 0 : index
    %360 = vector.load %arg12[%c1_313, %c0_314, %c0_315] : memref<2x16x256xf32, #tpu.memory_space<vmem>>, vector<1x16x256xf32>
    %361 = vector.shape_cast %360 : vector<1x16x256xf32> to vector<16x256xf32>
    %362 = vector.broadcast %350 : vector<16x1xf32> to vector<16x256xf32>
    %363 = arith.subf %361, %362 : vector<16x256xf32>
    %364 = arith.mulf %363, %363 : vector<16x256xf32>
    %cst_316 = arith.constant dense<0.000000e+00> : vector<16xf32>
    %365 = vector.multi_reduction <add>, %364, %cst_316 [1] : vector<16x256xf32> to vector<16xf32>
    %366 = vector.shape_cast %365 : vector<16xf32> to vector<16x1xf32>
    %367 = arith.addf %359, %366 : vector<16x1xf32>
    %c0_317 = arith.constant 0 : index
    %c0_318 = arith.constant 0 : index
    %368 = vector.load %arg10[%c0_317, %c0_318] : memref<16x1xf32, #tpu.memory_space<vmem>>, vector<16x1xf32>
    %cst_319 = arith.constant 0.001953125 : f32
    %369 = vector.broadcast %cst_319 : f32 to vector<16x1xf32>
    %370 = arith.mulf %367, %369 : vector<16x1xf32>
    %cst_320 = arith.constant 9.99999974E-6 : f32
    %371 = vector.broadcast %cst_320 : f32 to vector<16x1xf32>
    %372 = arith.addf %370, %371 : vector<16x1xf32>
    %373 = math.rsqrt %372 : vector<16x1xf32>
    %374 = arith.mulf %368, %373 : vector<16x1xf32>
    %c0_321 = arith.constant 0 : index
    %c0_322 = arith.constant 0 : index
    %375 = vector.load %arg11[%c0_321, %c0_322] : memref<16x1xf32, #tpu.memory_space<vmem>>, vector<16x1xf32>
    %376 = arith.mulf %350, %374 : vector<16x1xf32>
    %377 = arith.subf %375, %376 : vector<16x1xf32>
    %c0_323 = arith.constant 0 : index
    %c0_324 = arith.constant 0 : index
    %c0_325 = arith.constant 0 : index
    %378 = vector.load %arg12[%c0_323, %c0_324, %c0_325] : memref<2x16x256xf32, #tpu.memory_space<vmem>>, vector<1x16x256xf32>
    %379 = vector.shape_cast %378 : vector<1x16x256xf32> to vector<16x256xf32>
    %380 = vector.broadcast %374 : vector<16x1xf32> to vector<16x256xf32>
    %381 = arith.mulf %379, %380 : vector<16x256xf32>
    %382 = vector.broadcast %377 : vector<16x1xf32> to vector<16x256xf32>
    %383 = arith.addf %381, %382 : vector<16x256xf32>
    %c0_326 = arith.constant 0 : index
    %c0_327 = arith.constant 0 : index
    %c0_328 = arith.constant 0 : index
    %384 = vector.load %arg1[%c0_326, %c0_327, %c0_328] : memref<2x16x256xf32, #tpu.memory_space<vmem>>, vector<1x16x256xf32>
    %385 = vector.shape_cast %384 : vector<1x16x256xf32> to vector<16x256xf32>
    %386 = arith.addf %383, %385 : vector<16x256xf32>
    %c0_329 = arith.constant 0 : index
    %c0_330 = arith.constant 0 : index
    %c0_331 = arith.constant 0 : index
    %387 = vector.load %arg12[%c0_329, %c0_330, %c0_331] : memref<2x16x256xf32, #tpu.memory_space<vmem>>, vector<1x16x256xf32>
    %388 = vector.shape_cast %387 : vector<1x16x256xf32> to vector<16x256xf32>
    %389 = vector.shape_cast %386 : vector<16x256xf32> to vector<1x16x256xf32>
    tpu.vector_store %arg12[%c0_329, %c0_330, %c0_331], %389 {strides = array<i32>} : memref<2x16x256xf32, #tpu.memory_space<vmem>>, vector<1x16x256xf32>,
    %c1_332 = arith.constant 1 : index
    %c0_333 = arith.constant 0 : index
    %c0_334 = arith.constant 0 : index
    %390 = vector.load %arg12[%c1_332, %c0_333, %c0_334] : memref<2x16x256xf32, #tpu.memory_space<vmem>>, vector<1x16x256xf32>
    %391 = vector.shape_cast %390 : vector<1x16x256xf32> to vector<16x256xf32>
    %392 = vector.broadcast %374 : vector<16x1xf32> to vector<16x256xf32>
    %393 = arith.mulf %391, %392 : vector<16x256xf32>
    %394 = vector.broadcast %377 : vector<16x1xf32> to vector<16x256xf32>
    %395 = arith.addf %393, %394 : vector<16x256xf32>
    %c1_335 = arith.constant 1 : index
    %c0_336 = arith.constant 0 : index
    %c0_337 = arith.constant 0 : index
    %396 = vector.load %arg1[%c1_335, %c0_336, %c0_337] : memref<2x16x256xf32, #tpu.memory_space<vmem>>, vector<1x16x256xf32>
    %397 = vector.shape_cast %396 : vector<1x16x256xf32> to vector<16x256xf32>
    %398 = arith.addf %395, %397 : vector<16x256xf32>
    %c1_338 = arith.constant 1 : index
    %c0_339 = arith.constant 0 : index
    %c0_340 = arith.constant 0 : index
    %399 = vector.load %arg12[%c1_338, %c0_339, %c0_340] : memref<2x16x256xf32, #tpu.memory_space<vmem>>, vector<1x16x256xf32>
    %400 = vector.shape_cast %399 : vector<1x16x256xf32> to vector<16x256xf32>
    %401 = vector.shape_cast %398 : vector<16x256xf32> to vector<1x16x256xf32>
    tpu.vector_store %arg12[%c1_338, %c0_339, %c0_340], %401 {strides = array<i32>} : memref<2x16x256xf32, #tpu.memory_space<vmem>>, vector<1x16x256xf32>,
    return
  }
  func.func @transform_0(%arg0: i32) -> (i32, i32, i32) {
    %c0_i32 = arith.constant 0 : i32
    %c0_i32_0 = arith.constant 0 : i32
    %c0_i32_1 = arith.constant 0 : i32
    %c0_i32_2 = arith.constant 0 : i32
    return %c0_i32, %c0_i32_0, %c0_i32_1 : i32, i32, i32
  }
  func.func @transform_1(%arg0: i32) -> (i32, i32, i32) {
    %c0_i32 = arith.constant 0 : i32
    %c0_i32_0 = arith.constant 0 : i32
    %c0_i32_1 = arith.constant 0 : i32
    %c0_i32_2 = arith.constant 0 : i32
    return %c0_i32, %c0_i32_0, %c0_i32_1 : i32, i32, i32
  }
  func.func @transform_2(%arg0: i32) -> (i32, i32) {
    %c0_i32 = arith.constant 0 : i32
    %c0_i32_0 = arith.constant 0 : i32
    %c0_i32_1 = arith.constant 0 : i32
    return %c0_i32, %c0_i32_0 : i32, i32
  }
  func.func @transform_3(%arg0: i32) -> (i32, i32) {
    %c0_i32 = arith.constant 0 : i32
    %c0_i32_0 = arith.constant 0 : i32
    %c0_i32_1 = arith.constant 0 : i32
    return %c0_i32, %c0_i32_0 : i32, i32
  }
  func.func @transform_4(%arg0: i32) -> (i32, i32) {
    %c0_i32 = arith.constant 0 : i32
    %c0_i32_0 = arith.constant 0 : i32
    %c0_i32_1 = arith.constant 0 : i32
    return %c0_i32, %c0_i32_0 : i32, i32
  }
  func.func @transform_5(%arg0: i32) -> (i32, i32) {
    %c0_i32 = arith.constant 0 : i32
    %c0_i32_0 = arith.constant 0 : i32
    %c0_i32_1 = arith.constant 0 : i32
    return %c0_i32, %c0_i32_0 : i32, i32
  }
  func.func @transform_6(%arg0: i32) -> (i32, i32) {
    %c0_i32 = arith.constant 0 : i32
    %c0_i32_0 = arith.constant 0 : i32
    %c0_i32_1 = arith.constant 0 : i32
    return %c0_i32, %c0_i32_0 : i32, i32
  }
  func.func @transform_7(%arg0: i32) -> (i32, i32) {
    %c0_i32 = arith.constant 0 : i32
    %c0_i32_0 = arith.constant 0 : i32
    %c0_i32_1 = arith.constant 0 : i32
    return %c0_i32, %c0_i32_0 : i32, i32
  }
  func.func @transform_8(%arg0: i32) -> (i32, i32) {
    %c0_i32 = arith.constant 0 : i32
    %c0_i32_0 = arith.constant 0 : i32
    %c0_i32_1 = arith.constant 0 : i32
    return %c0_i32, %c0_i32_0 : i32, i32
  }
  func.func @transform_9(%arg0: i32) -> (i32, i32) {
    %c0_i32 = arith.constant 0 : i32
    %c0_i32_0 = arith.constant 0 : i32
    %c0_i32_1 = arith.constant 0 : i32
    return %c0_i32, %c0_i32_0 : i32, i32
  }
  func.func @transform_10(%arg0: i32) -> (i32, i32) {
    %c0_i32 = arith.constant 0 : i32
    %c0_i32_0 = arith.constant 0 : i32
    %c0_i32_1 = arith.constant 0 : i32
    return %c0_i32, %c0_i32_0 : i32, i32
  }
  func.func @transform_11(%arg0: i32) -> (i32, i32, i32) {
    %c0_i32 = arith.constant 0 : i32
    %c0_i32_0 = arith.constant 0 : i32
    %c0_i32_1 = arith.constant 0 : i32
    %c0_i32_2 = arith.constant 0 : i32
    return %c0_i32, %c0_i32_0, %c0_i32_1 : i32, i32, i32
  }
}

</mosaic_0001>

<bundles_post_ra>
// kernel: residual_block.1
= control target key start
LH: loop header
LB: loop body
LE: loop exit
PB: predicated region body
PF: predicated region fallthrough
CT: control target
= control target key end

     0   :  { %v65_v0 = vlaneseq  ;;  %s2422_s21 = smov 111   ;;  %s2423_s26 = smov 112   ;;  %vm77_vm0 = vcmask 908288   ;;  %vm128_vm1 = vcmask 916480   ;;  %vm202_vm2 = vcmask 121856   ;;  %s3723_s1 = inlined_call_operand.vmem [shape: f32[9,1,256], index: 1, kind: input, shape index: {}]   ;;  %s3724_s0 = inlined_call_operand.vmem [shape: f32[2,16,256], index: 0, kind: input, shape index: {}]   ;;  %s3725_s2 = inlined_call_operand.vmem [shape: bf16[16,144], index: 2, kind: input, shape index: {}]   ;;  %s3726_s3 = inlined_call_operand.vmem [shape: f32[16,1], index: 3, kind: input, shape index: {}]   ;;  %s3727_s6 = inlined_call_operand.<no memory space> [shape: f32[1,1], index: 6, kind: input, shape index: {}]   ;;  %s3728_s4 = inlined_call_operand.vmem [shape: f32[16,1], index: 4, kind: input, shape index: {}]   ;;  %s3729_s5 = inlined_call_operand.vmem [shape: f32[16,1], index: 5, kind: input, shape index: {}]   ;;  %s3730_s8 = inlined_call_operand.vmem [shape: f32[16,1], index: 8, kind: input, shape index: {}]   ;;  %s3731_s7 = inlined_call_operand.vmem [shape: bf16[16,144], index: 7, kind: input, shape index: {}]   ;;  %s3732_s9 = inlined_call_operand.vmem [shape: f32[16,1], index: 9, kind: input, shape index: {}]   ;;  %s3733_s10 = inlined_call_operand.vmem [shape: f32[16,1], index: 10, kind: input, shape index: {}]   ;;  %s3734_s11 = inlined_call_operand.vmem [shape: f32[2,16,256], index: 11, kind: output, shape index: {}]  }
   0x1   :  { %v586_v2 = vld [vmem:[%s3723_s1] sm:$0x3]  ;;  %v2331_v10 = vld [vmem:[%s3723_s1 + $0x2] sm:$0x3]  ;;  %v2332_v16 = vld [vmem:[%s3723_s1 + $0x4] sm:$0x3] }
   0x2   :  { %v66_v1 = vshrl.u32 %v65_v0, 7  ;;  %v63_v3 = vld [vmem:[%s3723_s1] sm:$0x3]  ;;  %v2345_v13 = vld [vmem:[%s3723_s1 + $0x2] sm:$0x3]  ;;  %s2424_s12 = smov 113  }
   0x3   :  { %v2346_v19 = vld [vmem:[%s3723_s1 + $0x4] sm:$0x3]  ;;  %v2333_v22 = vld [vmem:[%s3723_s1 + $0x6] sm:$0x3]  ;;  %s2425_s17 = smov 127   ;;  %s2426_s23 = smov 1  }
   0x4   :  { %v2497_v4 = vsub.s32 0, %v66_v1  ;;  %v2499_v5 = vsub.s32 1, %v66_v1  ;;  %v2347_v25 = vld [vmem:[%s3723_s1 + $0x6] sm:$0x3]  ;;  %v2334_v28 = vld [vmem:[%s3723_s1 + $0xa] sm:$0x3] }
   0x5   :  { %v2348_v31 = vld [vmem:[%s3723_s1 + $0xa] sm:$0x3]  ;;  %v2335_v34 = vld [vmem:[%s3723_s1 + $0xc] sm:$0x3]  ;;  %s2427_s29 = smov 15   ;;  %s2428_s16 = smov 16  }
   0x6   :  { %v591_v6 = vrot.slane %v586_v2, %v2497_v4  ;;  %v68_v7 = vrot.slane %v63_v3, %v2497_v4  ;;  %v595_v8 = vrot.slane %v586_v2, %v2499_v5  ;;  %v72_v9 = vrot.slane %v63_v3, %v2499_v5  ;;  %v2349_v37 = vld [vmem:[%s3723_s1 + $0xc] sm:$0x3]  ;;  %v2336_v40 = vld [vmem:[%s3723_s1 + $0xe] sm:$0x3]  ;;  %v2337_v46 = vld [vmem:[%s3723_s1 + $0x10] sm:$0x3] }
   0x7   :  { %v123_v11 = vrot.slane %v2331_v10, %v2499_v5  ;;  %v119_v12 = vrot.slane %v2331_v10, %v2497_v4  ;;  %v643_v14 = vrot.slane %v2345_v13, %v2499_v5  ;;  %v639_v15 = vrot.slane %v2345_v13, %v2497_v4  ;;  %v2350_v43 = vld [vmem:[%s3723_s1 + $0xe] sm:$0x3]  ;;  %v2351_v49 = vld [vmem:[%s3723_s1 + $0x10] sm:$0x3]  ;;  %s2429_s24 = smov 17   ;;  %v2617_v56 = vld [vmem:[%s3724_s0 + $0x38] sm:$0xff] }
   0x8   :  { %596 = vrot.lane.b32.xlu1 %v591_v6, %s2422_s21  ;;  %73 = vrot.lane.b32.xlu0 %v68_v7, %s2422_s21  ;;  %v174_v17 = vrot.slane %v2332_v16, %v2499_v5  ;;  %v170_v18 = vrot.slane %v2332_v16, %v2497_v4  ;;  %v691_v20 = vrot.slane %v2346_v19, %v2499_v5  ;;  %v2612_v55 = vld [vmem:[%s3724_s0 + $0x28] sm:$0xff]  ;;  %v2627_v58 = vld [vmem:[%s3724_s0 + $0x18] sm:$0xff]  ;;  %vm179_vm3 = vcmask 924672  }
   0x9   :  { %v687_v21 = vrot.slane %v2346_v19, %v2497_v4  ;;  %v225_v23 = vrot.slane %v2333_v22, %v2499_v5  ;;  %v221_v24 = vrot.slane %v2333_v22, %v2497_v4  ;;  %v739_v26 = vrot.slane %v2347_v25, %v2499_v5  ;;  %v2622_v57 = vld [vmem:[%s3724_s0 + $0x8] sm:$0xff] }
   0xa   :  { %v735_v27 = vrot.slane %v2347_v25, %v2497_v4  ;;  %v284_v29 = vrot.slane %v2334_v28, %v2499_v5  ;;  %v280_v30 = vrot.slane %v2334_v28, %v2497_v4  ;;  %v795_v32 = vrot.slane %v2348_v31, %v2499_v5 }
   0xb   :  { %v791_v33 = vrot.slane %v2348_v31, %v2497_v4  ;;  %v335_v35 = vrot.slane %v2335_v34, %v2499_v5  ;;  %v331_v36 = vrot.slane %v2335_v34, %v2497_v4  ;;  %v843_v38 = vrot.slane %v2349_v37, %v2499_v5 }
   0xc   :  { %598 = vrot.lane.b32.xlu1 %v595_v8, %s2422_s21  ;;  %75 = vrot.lane.b32.xlu0 %v72_v9, %s2422_s21  ;;  %v839_v39 = vrot.slane %v2349_v37, %v2497_v4  ;;  %v386_v41 = vrot.slane %v2336_v40, %v2499_v5  ;;  %v382_v42 = vrot.slane %v2336_v40, %v2497_v4  ;;  %v2696_v40 = vld [vmem:[%s3724_s0] sm:$0xff]  ;;  %vm151_vm4 = vcmask 130048  }
   0xd   :  { %v891_v44 = vrot.slane %v2350_v43, %v2499_v5  ;;  %v887_v45 = vrot.slane %v2350_v43, %v2497_v4  ;;  %v437_v47 = vrot.slane %v2337_v46, %v2499_v5  ;;  %v433_v48 = vrot.slane %v2337_v46, %v2497_v4 }
   0xe   :  { %v939_v50 = vrot.slane %v2351_v49, %v2499_v5  ;;  %v935_v51 = vrot.slane %v2351_v49, %v2497_v4  ;;  %vm230_vm5 = vcmask 1039360   ;;  %vm100_vm6 = vcmask 138240  }
   0xf   :  { %vm253_vm7 = vcmask 7168  }
  0x10   :  { %126 = vrot.lane.b32.xlu1 %v123_v11, %s2423_s26  ;;  %124 = vrot.lane.b32.xlu0 %v119_v12, %s2423_s26 }
  0x14   :  { %646 = vrot.lane.b32.xlu1 %v643_v14, %s2423_s26  ;;  %644 = vrot.lane.b32.xlu0 %v639_v15, %s2423_s26 }
  0x18   :  { %177 = vrot.lane.b32.xlu1 %v174_v17, %s2424_s12  ;;  %175 = vrot.lane.b32.xlu0 %v170_v18, %s2424_s12 }
  0x1c   :  { %694 = vrot.lane.b32.xlu1 %v691_v20, %s2424_s12  ;;  %692 = vrot.lane.b32.xlu0 %v687_v21, %s2424_s12 }
  0x20   :  { %228 = vrot.lane.b32.xlu1 %v225_v23, %s2425_s17  ;;  %226 = vrot.lane.b32.xlu0 %v221_v24, %s2425_s17 }
  0x24   :  { %742 = vrot.lane.b32.xlu1 %v739_v26, %s2425_s17  ;;  %740 = vrot.lane.b32.xlu0 %v735_v27, %s2425_s17 }
  0x28   :  { %287 = vrot.lane.b32.xlu1 %v284_v29, %s2426_s23  ;;  %285 = vrot.lane.b32.xlu0 %v280_v30, %s2426_s23 }
  0x2c   :  { %798 = vrot.lane.b32.xlu1 %v795_v32, %s2426_s23  ;;  %796 = vrot.lane.b32.xlu0 %v791_v33, %s2426_s23 }
  0x30   :  { %338 = vrot.lane.b32.xlu1 %v335_v35, %s2427_s29  ;;  %336 = vrot.lane.b32.xlu0 %v331_v36, %s2427_s29 }
  0x34   :  { %846 = vrot.lane.b32.xlu1 %v843_v38, %s2427_s29  ;;  %844 = vrot.lane.b32.xlu0 %v839_v39, %s2427_s29 }
  0x38   :  { %389 = vrot.lane.b32.xlu1 %v386_v41, %s2428_s16  ;;  %387 = vrot.lane.b32.xlu0 %v382_v42, %s2428_s16  ;;  %v2701_v41 = vld [vmem:[%s3724_s0 + $0x10] sm:$0xff] }
  0x3c   :  { %894 = vrot.lane.b32.xlu1 %v891_v44, %s2428_s16  ;;  %892 = vrot.lane.b32.xlu0 %v887_v45, %s2428_s16 }
  0x40   :  { %440 = vrot.lane.b32.xlu1 %v437_v47, %s2429_s24  ;;  %438 = vrot.lane.b32.xlu0 %v433_v48, %s2429_s24 }
  0x44   :  { %942 = vrot.lane.b32.xlu1 %v939_v50, %s2429_s24  ;;  %940 = vrot.lane.b32.xlu0 %v935_v51, %s2429_s24 }
  0x7a   :  { %v2607_v52 = vpop.permute.xlu1 %596  ;;  %v74_v53 = vpop.permute.xlu0 %73 }
  0x7b   :  { %v82_v54 = vmul.f32 0.0, %v74_v53  ;;  %v604_v8 = vmul.f32 0.0, %v2607_v52 }
  0x7d   :  { %v88_v59 = vpack.c.bf16 %v82_v54, %v82_v54  ;;  %v610_v15 = vpack.c.bf16 %v604_v8, %v604_v8 }
  0x7e   :  { %v2629_v60 = vpop.permute.xlu1 %598  ;;  %v76_v61 = vpop.permute.xlu0 %75 }
  0x7f   :  { %94 = vrot.lane.b32.xlu0 %v88_v59, %s2429_s24  ;;  %v606_v62 = vmul.f32 %v2612_v55, %v2629_v60  ;;  %v609_v63 = vmul.f32 %v2617_v56, %v2629_v60  ;;  %v84_v0 = vmul.f32 %v76_v61, %v2622_v57  ;;  %v87_v1 = vmul.f32 %v76_v61, %v2627_v58 }
  0x80   :  { %v78_v39 = vsel %vm77_vm0, %v74_v53, %v76_v61  ;;  %v600_v50 = vsel %vm77_vm0, %v2607_v52, %v2629_v60  ;;  %v2735_v52 = vld [vmem:[%s3724_s0 + $0x30] sm:$0xff] }
  0x81   :  { %v90_v6 = vpack.c.bf16 %v87_v1, %v84_v0  ;;  %v612_v9 = vpack.c.bf16 %v609_v63, %v606_v62  ;;  %v83_v48 = vmul.f32 %v78_v39, %v2696_v40  ;;  %v86_v49 = vmul.f32 %v78_v39, %v2701_v41  ;;  %v2730_v62 = vld [vmem:[%s3724_s0 + $0x20] sm:$0xff] }
  0x82   :  { %v2638_v2 = vpop.permute.xlu1 %126  ;;  %v2640_v3 = vpop.permute.xlu0 %124  ;;  %v605_v63 = vmul.f32 %v2730_v62, %v600_v50  ;;  %v608_v0 = vmul.f32 %v2735_v52, %v600_v50 }
  0x83   :  { %v133_v7 = vmul.f32 0.0, %v2640_v3  ;;  %98 = vrot.lane.b32.xlu1 %v90_v6, %s2429_s24  ;;  %v135_v13 = vmul.f32 %v2638_v2, %v2622_v57  ;;  %v138_v14 = vmul.f32 %v2638_v2, %v2627_v58  ;;  %v89_v60 = vpack.c.bf16 %v86_v49, %v83_v48 }
  0x84   :  { %v129_v1 = vsel %vm128_vm1, %v2640_v3, %v2638_v2 }
  0x85   :  { %v139_v10 = vpack.c.bf16 %v133_v7, %v133_v7  ;;  %v141_v21 = vpack.c.bf16 %v138_v14, %v135_v13 }
  0x86   :  { %v2645_v11 = vpop.permute.xlu1 %646  ;;  %v2647_v12 = vpop.permute.xlu0 %644 }
  0x87   :  { %145 = vrot.lane.b32.xlu0 %v139_v10, %s2428_s16  ;;  %620 = vrot.lane.b32.xlu1 %v612_v9, %s2429_s24  ;;  %v654_v19 = vmul.f32 %v2612_v55, %v2645_v11  ;;  %v657_v20 = vmul.f32 %v2617_v56, %v2645_v11  ;;  %v652_v26 = vmul.f32 0.0, %v2647_v12 }
  0x89   :  { %v660_v25 = vpack.c.bf16 %v657_v20, %v654_v19  ;;  %v658_v35 = vpack.c.bf16 %v652_v26, %v652_v26  ;;  %v611_v19 = vpack.c.bf16 %v608_v0, %v605_v63  ;;  %v648_v20 = vsel %vm128_vm1, %v2647_v12, %v2645_v11 }
  0x8a   :  { %v2655_v16 = vpop.permute.xlu1 %177  ;;  %v2657_v17 = vpop.permute.xlu0 %175  ;;  %v653_v12 = vmul.f32 %v2730_v62, %v648_v20 }
  0x8b   :  { %v184_v18 = vmul.f32 0.0, %v2657_v17  ;;  %616 = vrot.lane.b32.xlu1 %v610_v15, %s2429_s24  ;;  %v186_v30 = vmul.f32 %v2655_v16, %v2622_v57  ;;  %v189_v31 = vmul.f32 %v2655_v16, %v2627_v58  ;;  %v134_v15 = vmul.f32 %v129_v1, %v2696_v40 }
  0x8d   :  { %v190_v22 = vpack.c.bf16 %v184_v18, %v184_v18  ;;  %v192_v38 = vpack.c.bf16 %v189_v31, %v186_v30  ;;  %v137_v18 = vmul.f32 %v129_v1, %v2701_v41  ;;  %v656_v31 = vmul.f32 %v2735_v52, %v648_v20 }
  0x8e   :  { %v2665_v23 = vpop.permute.xlu1 %694  ;;  %v2667_v24 = vpop.permute.xlu0 %692 }
  0x8f   :  { %196 = vrot.lane.b32.xlu0 %v190_v22, %s2427_s29  ;;  %149 = vrot.lane.b32.xlu1 %v141_v21, %s2428_s16  ;;  %v702_v36 = vmul.f32 %v2612_v55, %v2665_v23  ;;  %v705_v37 = vmul.f32 %v2617_v56, %v2665_v23  ;;  %v700_v51 = vmul.f32 0.0, %v2667_v24  ;;  %v659_v50 = vpack.c.bf16 %v656_v31, %v653_v12 }
  0x91   :  { %v708_v46 = vpack.c.bf16 %v705_v37, %v702_v36  ;;  %v706_v6 = vpack.c.bf16 %v700_v51, %v700_v51 }
  0x92   :  { %v2672_v27 = vpop.permute.xlu1 %228  ;;  %v2674_v28 = vpop.permute.xlu0 %226 }
  0x93   :  { %v235_v29 = vmul.f32 0.0, %v2674_v28  ;;  %668 = vrot.lane.b32.xlu1 %v660_v25, %s2428_s16  ;;  %v237_v59 = vmul.f32 %v2672_v27, %v2622_v57  ;;  %v240_v61 = vmul.f32 %v2672_v27, %v2627_v58 }
  0x95   :  { %v241_v32 = vpack.c.bf16 %v235_v29, %v235_v29  ;;  %v243_v9 = vpack.c.bf16 %v240_v61, %v237_v59  ;;  %v696_v59 = vsel %vm179_vm3, %v2667_v24, %v2665_v23 }
  0x96   :  { %v2682_v33 = vpop.permute.xlu1 %742  ;;  %v2684_v34 = vpop.permute.xlu0 %740 }
  0x97   :  { %247 = vrot.lane.b32.xlu0 %v241_v32, %s2426_s23  ;;  %664 = vrot.lane.b32.xlu1 %v658_v35, %s2428_s16  ;;  %v750_v13 = vmul.f32 %v2612_v55, %v2682_v33  ;;  %v753_v14 = vmul.f32 %v2617_v56, %v2682_v33  ;;  %v140_v32 = vpack.c.bf16 %v137_v18, %v134_v15  ;;  %v748_v36 = vmul.f32 0.0, %v2684_v34 }
  0x98   :  { %v180_v35 = vsel %vm179_vm3, %v2657_v17, %v2655_v16  ;;  %v265_v15 = vpack.c.bf16 %v2627_v58, %v2622_v57  ;;  %v231_v18 = vsel %vm230_vm5, %v2674_v28, %v2672_v27 }
  0x99   :  { %v756_v29 = vpack.c.bf16 %v753_v14, %v750_v13  ;;  %v185_v48 = vmul.f32 %v180_v35, %v2696_v40  ;;  %v188_v49 = vmul.f32 %v180_v35, %v2701_v41  ;;  %v754_v61 = vpack.c.bf16 %v748_v36, %v748_v36 }
  0x9a   :  { %v2703_v42 = vpop.permute.xlu1 %287  ;;  %v2705_v43 = vpop.permute.xlu0 %285  ;;  %v704_v13 = vmul.f32 %v2735_v52, %v696_v59 }
  0x9b   :  { %v294_v44 = vmul.f32 %v2705_v43, %v2696_v40  ;;  %v297_v45 = vmul.f32 %v2705_v43, %v2701_v41  ;;  %200 = vrot.lane.b32.xlu1 %v192_v38, %s2427_s29  ;;  %v296_v16 = vmul.f32 0.0, %v2703_v42  ;;  %v191_v14 = vpack.c.bf16 %v188_v49, %v185_v48 }
  0x9d   :  { %v300_v47 = vpack.c.bf16 %v297_v45, %v294_v44  ;;  %v302_v24 = vpack.c.bf16 %v296_v16, %v296_v16  ;;  %v239_v16 = vmul.f32 %v231_v18, %v2701_v41 }
  0x9e   :  { %v2718_v53 = vpop.permute.xlu1 %798  ;;  %v2720_v54 = vpop.permute.xlu0 %796 }
  0x9f   :  { %306 = vrot.lane.b32.xlu0 %v300_v47, %s2425_s17  ;;  %716 = vrot.lane.b32.xlu1 %v708_v46, %s2427_s29  ;;  %v806_v23 = vmul.f32 0.0, %v2718_v53  ;;  %v807_v12 = vmul.f32 %v2735_v52, %v2720_v54 }
  0xa1   :  { %v812_v28 = vpack.c.bf16 %v806_v23, %v806_v23  ;;  %v777_v23 = vpack.c.bf16 %v2617_v56, %v2612_v55 }
  0xa2   :  { %v2743_v7 = vpop.permute.xlu1 %338  ;;  %v2745_v8 = vpop.permute.xlu0 %336 }
  0xa3   :  { %96 = vrot.lane.b32.xlu0 %v89_v60, %s2429_s24  ;;  %v341_v10 = vsel %vm202_vm2, %v2745_v8, %v2743_v7  ;;  %712 = vrot.lane.b32.xlu1 %v706_v6, %s2427_s29 }
  0xa4   :  { %v2757_v2 = vmul.f32 %v341_v10, %v2622_v57  ;;  %v2760_v3 = vmul.f32 %v341_v10, %v2627_v58  ;;  %v701_v10 = vmul.f32 %v2730_v62, %v696_v59 }
  0xa6   :  { %v2767_v21 = vpop.permute.xlu1 %846  ;;  %v2769_v22 = vpop.permute.xlu0 %844  ;;  %v352_v25 = vpack.c.bf16 %v2760_v3, %v2757_v2  ;;  %v707_v48 = vpack.c.bf16 %v704_v13, %v701_v10  ;;  %v347_v13 = vmul.f32 0.0, %v2743_v7 }
  0xa7   :  { %618 = vrot.lane.b32.xlu0 %v611_v19, %s2429_s24  ;;  %v848_v26 = vsel %vm202_vm2, %v2769_v22, %v2767_v21  ;;  %251 = vrot.lane.b32.xlu1 %v243_v9, %s2426_s23  ;;  %v804_v19 = vmul.f32 %v2730_v62, %v2720_v54 }
  0xa8   :  { %v2779_v30 = vmul.f32 %v2612_v55, %v848_v26  ;;  %v2782_v11 = vmul.f32 %v2617_v56, %v848_v26 }
  0xaa   :  { %v2790_v37 = vpop.permute.xlu1 %389  ;;  %v859_v38 = vpack.c.bf16 %v2782_v11, %v2779_v30  ;;  %v388_v39 = vpop.permute.xlu0 %387 }
  0xab   :  { %147 = vrot.lane.b32.xlu0 %v140_v32, %s2428_s16  ;;  %v392_v44 = vsel %vm151_vm4, %v388_v39, %v2790_v37  ;;  %v2798_v45 = vmul.f32 %v388_v39, %v2696_v40  ;;  %v2801_v46 = vmul.f32 %v388_v39, %v2701_v41  ;;  %764 = vrot.lane.b32.xlu1 %v756_v29, %s2426_s23 }
  0xac   :  { %v2806_v17 = vmul.f32 %v392_v44, %v2622_v57  ;;  %v2809_v47 = vmul.f32 %v392_v44, %v2627_v58  ;;  %v264_v39 = vpack.c.bf16 %v2701_v41, %v2696_v40  ;;  %v236_v44 = vmul.f32 %v231_v18, %v2696_v40 }
  0xad   :  { %v402_v51 = vpack.c.bf16 %v2801_v46, %v2798_v45  ;;  %v2430_v45 = vmov 0   ;;  %v492_v46 = vld [vmem:[%s3726_s3] sm:$0xff] }
  0xae   :  { %v2818_v60 = vpop.permute.xlu1 %894  ;;  %v2820_v63 = vpop.permute.xlu0 %892  ;;  %v403_v0 = vpack.c.bf16 %v2809_v47, %v2806_v17  ;;  %v2410_v17 = vld [vmem:[%s3725_s2 + $0x4] ss:$8 sps:$4 sm:$0xff]   ;;  %2407 = vset.pattern.permute.xlu1 %v2430_v45  ;;  %2406 = vset.pattern.permute.xlu0 %v2430_v45 }
  0xaf   :  { %666 = vrot.lane.b32.xlu0 %v659_v50, %s2428_s16  ;;  %v896_v1 = vsel %vm151_vm4, %v2820_v63, %v2818_v60  ;;  %760 = vrot.lane.b32.xlu1 %v754_v61, %s2426_s23  ;;  %v744_v50 = vsel %vm230_vm5, %v2684_v34, %v2682_v33  ;;  %v493_v47 = vld [vmem:[%s3726_s3 + $0x8] sm:$0xff] }
  0xb0   :  { %v2831_v6 = vmul.f32 %v2612_v55, %v896_v1  ;;  %v2834_v9 = vmul.f32 %v2617_v56, %v896_v1  ;;  %v749_v18 = vmul.f32 %v2730_v62, %v744_v50  ;;  %2340 = vmatprep.mubr.msk.bf16.mxu0 %vm151_vm4, %v2410_v17  ;;  %2354 = vmatprep.mubr.msk.bf16.mxu1 %vm151_vm4, %v2410_v17 }
  0xb2   :  { %v2845_v20 = vpop.permute.xlu1 %440  ;;  %v907_v26 = vpack.c.bf16 %v2834_v9, %v2831_v6  ;;  %v439_v29 = vpop.permute.xlu0 %438 }
  0xb3   :  { %198 = vrot.lane.b32.xlu0 %v191_v14, %s2427_s29  ;;  %v443_v31 = vsel %vm100_vm6, %v439_v29, %v2845_v20  ;;  %v2855_v32 = vmul.f32 %v439_v29, %v2696_v40  ;;  %v2858_v27 = vmul.f32 %v439_v29, %v2701_v41  ;;  %310 = vrot.lane.b32.xlu1 %v302_v24, %s2425_s17  ;;  %v449_v2 = vmul.f32 0.0, %v2845_v20 }
  0xb4   :  { %v2862_v35 = vmul.f32 %v443_v31, %v2622_v57  ;;  %v2865_v36 = vmul.f32 %v443_v31, %v2627_v58  ;;  %v810_v24 = vpack.c.bf16 %v807_v12, %v804_v19  ;;  %v776_v14 = vpack.c.bf16 %v2735_v52, %v2730_v62 }
  0xb5   :  { %v453_v49 = vpack.c.bf16 %v2858_v27, %v2855_v32  ;;  %v752_v29 = vmul.f32 %v2735_v52, %v744_v50  ;;  %v242_v19 = vpack.c.bf16 %v239_v16, %v236_v44  ;;  %v290_v12 = vsel %vm253_vm7, %v2705_v43, %v2703_v42 }
  0xb6   :  { %v943_v59 = vpop.permute.xlu1 %942  ;;  %v941_v61 = vpop.permute.xlu0 %940  ;;  %v454_v1 = vpack.c.bf16 %v2865_v36, %v2862_v35  ;;  %v800_v31 = vsel %vm253_vm7, %v2720_v54, %v2718_v53  ;;  %v295_v44 = vmul.f32 %v290_v12, %v2622_v57  ;;  %v298_v16 = vmul.f32 %v290_v12, %v2627_v58 }
  0xb7   :  { %714 = vrot.lane.b32.xlu0 %v707_v48, %s2427_s29  ;;  %v944_v10 = vsel %vm100_vm6, %v941_v61, %v943_v59  ;;  %820 = vrot.lane.b32.xlu1 %v812_v28, %s2425_s17  ;;  %v854_v28 = vmul.f32 0.0, %v2767_v21  ;;  %v353_v48 = vpack.c.bf16 %v347_v13, %v347_v13  ;;  %v755_v50 = vpack.c.bf16 %v752_v29, %v749_v18 }
  0xb8   :  { %v2885_v33 = vmul.f32 %v2612_v55, %v944_v10  ;;  %v2888_v34 = vmul.f32 %v2617_v56, %v944_v10  ;;  %v805_v42 = vmul.f32 %v2612_v55, %v800_v31  ;;  %v808_v43 = vmul.f32 %v2617_v56, %v800_v31 }
  0xb9   :  { %v852_v53 = vmul.f32 %v2730_v62, %v2769_v22  ;;  %v855_v54 = vmul.f32 %v2735_v52, %v2769_v22  ;;  %v860_v21 = vpack.c.bf16 %v854_v28, %v854_v28  ;;  %v398_v13 = vmul.f32 0.0, %v2790_v37 }
  0xba   :  { %v955_v7 = vpack.c.bf16 %v2888_v34, %v2885_v33  ;;  %v811_v10 = vpack.c.bf16 %v808_v43, %v805_v42  ;;  %v902_v34 = vmul.f32 0.0, %v2818_v60  ;;  %v900_v22 = vmul.f32 %v2730_v62, %v2820_v63 }
  0xbb   :  { %249 = vrot.lane.b32.xlu0 %v242_v19, %s2426_s23  ;;  %816 = vrot.lane.b32.xlu1 %v810_v24, %s2425_s17  ;;  %v301_v24 = vpack.c.bf16 %v298_v16, %v295_v44  ;;  %v858_v33 = vpack.c.bf16 %v855_v54, %v852_v53  ;;  %v404_v18 = vpack.c.bf16 %v398_v13, %v398_v13 }
  0xbc   :  { %v903_v37 = vmul.f32 %v2735_v52, %v2820_v63  ;;  %v908_v29 = vpack.c.bf16 %v902_v34, %v902_v34  ;;  %v345_v19 = vmul.f32 %v2745_v8, %v2696_v40  ;;  %v348_v60 = vmul.f32 %v2745_v8, %v2701_v41 }
  0xbd   :  { %v950_v63 = vmul.f32 0.0, %v943_v59  ;;  %v455_v12 = vpack.c.bf16 %v449_v2, %v449_v2  ;;  %v948_v8 = vmul.f32 %v2730_v62, %v941_v61  ;;  %v951_v30 = vmul.f32 %v2735_v52, %v941_v61 }
  0xbe   :  { %v906_v3 = vpack.c.bf16 %v903_v37, %v900_v22 }
  0xbf   :  { %762 = vrot.lane.b32.xlu0 %v755_v50, %s2426_s23  ;;  %361 = vrot.lane.b32.xlu1 %v353_v48, %s2424_s12  ;;  %v956_v11 = vpack.c.bf16 %v950_v63, %v950_v63 }
  0xc3   :  { %308 = vrot.lane.b32.xlu0 %v301_v24, %s2425_s17  ;;  %868 = vrot.lane.b32.xlu1 %v860_v21, %s2424_s12 }
  0xc7   :  { %818 = vrot.lane.b32.xlu0 %v811_v10, %s2425_s17  ;;  %864 = vrot.lane.b32.xlu1 %v858_v33, %s2424_s12 }
  0xcb   :  { %359 = vrot.lane.b32.xlu0 %v352_v25, %s2424_s12  ;;  %412 = vrot.lane.b32.xlu1 %v404_v18, %s2423_s26  ;;  %v351_v25 = vpack.c.bf16 %v348_v60, %v345_v19 }
  0xcf   :  { %866 = vrot.lane.b32.xlu0 %v859_v38, %s2424_s12  ;;  %916 = vrot.lane.b32.xlu1 %v908_v29, %s2423_s26  ;;  %v954_v38 = vpack.c.bf16 %v951_v30, %v948_v8 }
  0xd3   :  { %357 = vrot.lane.b32.xlu0 %v351_v25, %s2424_s12  ;;  %912 = vrot.lane.b32.xlu1 %v906_v3, %s2423_s26 }
  0xd7   :  { %410 = vrot.lane.b32.xlu0 %v403_v0, %s2423_s26  ;;  %463 = vrot.lane.b32.xlu1 %v455_v12, %s2422_s21 }
  0xdb   :  { %914 = vrot.lane.b32.xlu0 %v907_v26, %s2423_s26  ;;  %964 = vrot.lane.b32.xlu1 %v956_v11, %s2422_s21 }
  0xdf   :  { %408 = vrot.lane.b32.xlu0 %v402_v51, %s2423_s26  ;;  %960 = vrot.lane.b32.xlu1 %v954_v38, %s2422_s21 }
  0xe3   :  { %461 = vrot.lane.b32.xlu0 %v454_v1, %s2422_s21  ;;  %501 = vperm.xlu1 %2407, %v493_v47  }
  0xe7   :  { %962 = vrot.lane.b32.xlu0 %v955_v7, %s2422_s21  ;;  %996 = vperm.xlu1 %2407, %v492_v46  }
  0xeb   :  { %459 = vrot.lane.b32.xlu0 %v453_v49, %s2422_s21 }
  0xef   :  { %496 = vperm.xlu0 %2406, %v492_v46  }
  0xf1   :  { %v95_v9 = vpop.permute.xlu0 %94 }
  0xf3   :  { %1001 = vperm.xlu0 %2406, %v493_v47  }
  0xf5   :  { %v99_v51 = vpop.permute.xlu1 %98 }
  0xf9   :  { %v621_v0 = vpop.permute.xlu1 %620  ;;  %v146_v26 = vpop.permute.xlu0 %145 }
  0xfd   :  { %v617_v6 = vpop.permute.xlu1 %616 }
 0x101   :  { %v150_v20 = vpop.permute.xlu1 %149  ;;  %v197_v36 = vpop.permute.xlu0 %196 }
 0x105   :  { %v669_v35 = vpop.permute.xlu1 %668 }
 0x109   :  { %v665_v59 = vpop.permute.xlu1 %664  ;;  %v248_v61 = vpop.permute.xlu0 %247 }
 0x10d   :  { %v201_v1 = vpop.permute.xlu1 %200 }
 0x111   :  { %v307_v7 = vpop.permute.xlu0 %306  ;;  %v717_v31 = vpop.permute.xlu1 %716 }
 0x115   :  { %v97_v28 = vpop.permute.xlu0 %96  ;;  %v713_v48 = vpop.permute.xlu1 %712 }
 0x116   :  { %v102_v32 = vsel %vm100_vm6, %v97_v28, %v99_v51  ;;  %v101_v27 = vsel %vm100_vm6, %v95_v9, %v97_v28 }
 0x117   :  { %516 = vmatprep.subr.bf16.mxu0 %v102_v32 }
 0x118   :  { %517 = vmatpush1.bf16.msra.mxu0 %v101_v27  ;;  %v2408_v27 = vld [vmem:[%s3725_s2] ss:$8 sps:$4 sm:$0xff]  }
 0x119   :  { %v619_v49 = vpop.permute.xlu0 %618  ;;  %v252_v50 = vpop.permute.xlu1 %251 }
 0x11a   :  { %v623_v44 = vsel %vm100_vm6, %v619_v49, %v621_v0  ;;  %v622_v16 = vsel %vm100_vm6, %v617_v6, %v619_v49 }
 0x11b   :  { %1016 = vmatprep.subr.bf16.mxu1 %v623_v44 }
 0x11c   :  { %1017 = vmatpush1.bf16.msra.mxu1 %v622_v16 }
 0x11d   :  { %v148_v42 = vpop.permute.xlu0 %147  ;;  %v765_v43 = vpop.permute.xlu1 %764 }
 0x11e   :  { %v153_v53 = vsel %vm151_vm4, %v148_v42, %v150_v20  ;;  %v152_v54 = vsel %vm151_vm4, %v146_v26, %v148_v42 }
 0x11f   :  { %518 = vmatprep.subr.bf16.mxu0 %v153_v53 }
 0x120   :  { %519 = vmatpush1.bf16.msra.mxu0 %v152_v54 }
 0x121   :  { %v667_v21 = vpop.permute.xlu0 %666  ;;  %v761_v24 = vpop.permute.xlu1 %760 }
 0x122   :  { %v671_v10 = vsel %vm151_vm4, %v667_v21, %v669_v35  ;;  %v670_v13 = vsel %vm151_vm4, %v665_v59, %v667_v21 }
 0x123   :  { %1018 = vmatprep.subr.bf16.mxu1 %v671_v10 }
 0x124   :  { %1019 = vmatpush1.bf16.msra.mxu1 %v670_v13 }
 0x125   :  { %v199_v33 = vpop.permute.xlu0 %198  ;;  %v311_v22 = vpop.permute.xlu1 %310 }
 0x126   :  { %v204_v34 = vsel %vm202_vm2, %v199_v33, %v201_v1  ;;  %v203_v18 = vsel %vm202_vm2, %v197_v36, %v199_v33 }
 0x127   :  { %520 = vmatprep.subr.bf16.mxu0 %v204_v34 }
 0x128   :  { %521 = vmatpush1.bf16.msra.mxu0 %v203_v18 }
 0x129   :  { %v715_v37 = vpop.permute.xlu0 %714  ;;  %v821_v60 = vpop.permute.xlu1 %820 }
 0x12a   :  { %v719_v29 = vsel %vm202_vm2, %v715_v37, %v717_v31  ;;  %v718_v19 = vsel %vm202_vm2, %v713_v48, %v715_v37 }
 0x12b   :  { %1020 = vmatprep.subr.bf16.mxu1 %v719_v29 }
 0x12c   :  { %1021 = vmatpush1.bf16.msra.mxu1 %v718_v19 }
 0x12d   :  { %v250_v2 = vpop.permute.xlu0 %249  ;;  %v817_v63 = vpop.permute.xlu1 %816 }
 0x12e   :  { %v255_v3 = vsel %vm253_vm7, %v250_v2, %v252_v50  ;;  %v254_v25 = vsel %vm253_vm7, %v248_v61, %v250_v2 }
 0x12f   :  { %522 = vmatprep.subr.bf16.mxu0 %v255_v3 }
 0x130   :  { %523 = vmatpush1.bf16.msra.mxu0 %v254_v25 }
 0x131   :  { %v763_v12 = vpop.permute.xlu0 %762  ;;  %524 = vmatprep.subr.bf16.mxu0 %v265_v15  ;;  %v362_v11 = vpop.permute.xlu1 %361 }
 0x132   :  { %v767_v8 = vsel %vm253_vm7, %v763_v12, %v765_v43  ;;  %v766_v30 = vsel %vm253_vm7, %v761_v24, %v763_v12 }
 0x133   :  { %1022 = vmatprep.subr.bf16.mxu1 %v767_v8 }
 0x134   :  { %525 = vmatpush1.bf16.msra.mxu0 %v264_v39  ;;  %1023 = vmatpush1.bf16.msra.mxu1 %v766_v30  ;;  %v16_v30 = vstv %s3727_s6 }
 0x135   :  { %v309_v38 = vpop.permute.xlu0 %308  ;;  %1024 = vmatprep.subr.bf16.mxu1 %v777_v23  ;;  %v869_v58 = vpop.permute.xlu1 %868  ;;  %17 = vst [vmem:[#allocation5] sm:$0x1] %v16_v30 }
 0x136   :  { %v314_v17 = vsel %vm230_vm5, %v309_v38, %v311_v22  ;;  %v313_v57 = vsel %vm230_vm5, %v307_v7, %v309_v38 }
 0x137   :  { %526 = vmatprep.subr.bf16.mxu0 %v314_v17 }
 0x138   :  { %527 = vmatpush1.bf16.msra.mxu0 %v313_v57  ;;  %1025 = vmatpush1.bf16.msra.mxu1 %v776_v14 }
 0x139   :  { %v819_v15 = vpop.permute.xlu0 %818  ;;  %v865_v39 = vpop.permute.xlu1 %864 }
 0x13a   :  { %v823_v40 = vsel %vm230_vm5, %v819_v15, %v821_v60  ;;  %v822_v41 = vsel %vm230_vm5, %v817_v63, %v819_v15 }
 0x13b   :  { %1026 = vmatprep.subr.bf16.mxu1 %v823_v40 }
 0x13c   :  { %1027 = vmatpush1.bf16.msra.mxu1 %v822_v41 }
 0x13d   :  { %v360_v55 = vpop.permute.xlu0 %359  ;;  %v413_v23 = vpop.permute.xlu1 %412 }
 0x13e   :  { %v365_v56 = vsel %vm179_vm3, %v360_v55, %v362_v11 }
 0x13f   :  { %528 = vmatprep.subr.bf16.mxu0 %v365_v56 }
 0x141   :  { %v867_v47 = vpop.permute.xlu0 %866  ;;  %v917_v62 = vpop.permute.xlu1 %916 }
 0x142   :  { %v871_v45 = vsel %vm179_vm3, %v867_v47, %v869_v58  ;;  %v870_v46 = vsel %vm179_vm3, %v865_v39, %v867_v47 }
 0x143   :  { %1028 = vmatprep.subr.bf16.mxu1 %v871_v45 }
 0x144   :  { %1029 = vmatpush1.bf16.msra.mxu1 %v870_v46 }
 0x145   :  { %v358_v52 = vpop.permute.xlu0 %357  ;;  %v913_v51 = vpop.permute.xlu1 %912 }
 0x146   :  { %v364_v14 = vsel %vm179_vm3, %v358_v52, %v360_v55 }
 0x147   :  { %529 = vmatpush1.bf16.msra.mxu0 %v364_v14 }
 0x149   :  { %v411_v0 = vpop.permute.xlu0 %410  ;;  %v464_v9 = vpop.permute.xlu1 %463 }
 0x14a   :  { %v416_v6 = vsel %vm128_vm1, %v411_v0, %v413_v23 }
 0x14b   :  { %530 = vmatprep.subr.bf16.mxu0 %v416_v6 }
 0x14d   :  { %v915_v20 = vpop.permute.xlu0 %914  ;;  %v965_v59 = vpop.permute.xlu1 %964 }
 0x14e   :  { %v919_v26 = vsel %vm128_vm1, %v915_v20, %v917_v62  ;;  %v918_v35 = vsel %vm128_vm1, %v913_v51, %v915_v20 }
 0x14f   :  { %1030 = vmatprep.subr.bf16.mxu1 %v919_v26 }
 0x150   :  { %1031 = vmatpush1.bf16.msra.mxu1 %v918_v35 }
 0x151   :  { %v409_v36 = vpop.permute.xlu0 %408  ;;  %v961_v31 = vpop.permute.xlu1 %960 }
 0x152   :  { %v415_v61 = vsel %vm128_vm1, %v409_v36, %v411_v0 }
 0x153   :  { %531 = vmatpush1.bf16.msra.mxu0 %v415_v61 }
 0x155   :  { %v462_v1 = vpop.permute.xlu0 %461 }
 0x156   :  { %v467_v7 = vsel %vm77_vm0, %v462_v1, %v464_v9 }
 0x157   :  { %532 = vmatprep.subr.bf16.mxu0 %v467_v7  ;;  %v1190_v7 = vld [vmem:[%s3723_s1] sm:$0x3] }
 0x159   :  { %v963_v28 = vpop.permute.xlu0 %962 }
 0x15a   :  { %v967_v48 = vsel %vm77_vm0, %v963_v28, %v965_v59  ;;  %v966_v32 = vsel %vm77_vm0, %v961_v31, %v963_v28  ;;  %v1195_v31 = vrot.slane %v1190_v7, %v2497_v4  ;;  %v1719_v28 = vld [vmem:[%s3723_s1] sm:$0x3] }
 0x15b   :  { %1032 = vmatprep.subr.bf16.mxu1 %v967_v48  ;;  %v1724_v48 = vrot.slane %v1719_v28, %v2497_v4 }
 0x15c   :  { %1033 = vmatpush1.bf16.msra.mxu1 %v966_v32  ;;  %v2356_v32 = vld [vmem:[%s3723_s1 + $0x2] sm:$0x3] }
 0x15d   :  { %v460_v49 = vpop.permute.xlu0 %459 }
 0x15e   :  { %v466_v50 = vsel %vm77_vm0, %v460_v49, %v462_v1  ;;  %v2355_v1 = vld [vmem:[#allocation5] ss:$0 sm:$0xff]  ;;  %v1243_v49 = vrot.slane %v2356_v32, %v2497_v4 }
 0x15f   :  { %533 = vmatpush1.bf16.msra.mxu0 %v466_v50  ;;  %1049 = vmatmul.mubr.bf16.vlgmr.msra.gmra.mrb[0].mxu1 %v2408_v27  ;;  %v2367_v50 = vld [vmem:[%s3723_s1 + $0x2] sm:$0x3] }
 0x162   :  { %549 = vmatmul.mubr.bf16.vlgmr.msra.gmra.mrb[0].mxu0 %v2408_v27  ;;  %v502_v16 = vpop.permute.xlu1 %501  ;;  %v1199_v27 = vrot.slane %v1190_v7, %v2499_v5 }
 0x166   :  { %v997_v22 = vpop.permute.xlu1 %996 }
 0x16e   :  { %v497_v44 = vpop.permute.xlu0 %496 }
 0x172   :  { %v1002_v13 = vpop.permute.xlu0 %1001 }
 0x232   :  { %v1050_v42 = vpop.f32.mrb[0].mxu1 }
 0x233   :  { %v1052_v43 = vpop.f32.mrb[1].mxu1  ;;  %v3040_v3 = vadd.f32 %v1050_v42, %v997_v22  ;;  %v2357_v42 = vld [vmem:[%s3723_s1 + $0x4] sm:$0x3] }
 0x234   :  { %v1054_v53 = vpop.f32.mrb[2].mxu1  ;;  %v3042_v25 = vadd.f32 %v1052_v43, %v997_v22  ;;  %v1247_v43 = vrot.slane %v2356_v32, %v2499_v5 }
 0x235   :  { %v550_v54 = vpop.f32.mrb[0].mxu0  ;;  %v1056_v21 = vpop.f32.mrb[3].mxu1  ;;  %v3034_v19 = vadd.f32 %v1054_v53, %v1002_v13  ;;  %v1291_v53 = vrot.slane %v2357_v42, %v2497_v4 }
 0x236   :  { %v3026_v24 = vadd.f32 %v550_v54, %v497_v44  ;;  %v552_v10 = vpop.f32.mrb[1].mxu0  ;;  %v3036_v60 = vadd.f32 %v1056_v21, %v1002_v13  ;;  %v1064_v8 = vadd.f32 %v3042_v25, %v3040_v3  ;;  %v2368_v54 = vld [vmem:[%s3723_s1 + $0x4] sm:$0x3]  ;;  %v1776_v21 = vrot.slane %v2367_v50, %v2499_v5  ;;  %v2358_v13 = vld [vmem:[%s3723_s1 + $0x6] sm:$0x3] }
 0x237   :  { %v3028_v33 = vadd.f32 %v552_v10, %v497_v44  ;;  %v554_v34 = vpop.f32.mrb[2].mxu0  ;;  %v1728_v44 = vrot.slane %v1719_v28, %v2499_v5  ;;  %v1820_v10 = vrot.slane %v2368_v54, %v2497_v4  ;;  %v1339_v22 = vrot.slane %v2358_v13, %v2497_v4  ;;  %v1115_v28 = vld [vmem:[%s3728_s4 + $0x8] sm:$0xff] }
 0x238   :  { %v3030_v18 = vadd.f32 %v554_v34, %v502_v16  ;;  %v556_v37 = vpop.f32.mrb[3].mxu0  ;;  %v1067_v12 = vadd.f32 %v3036_v60, %v3034_v19  ;;  %v1295_v34 = vrot.slane %v2357_v42, %v2499_v5 }
 0x239   :  { %v3032_v29 = vadd.f32 %v556_v37, %v502_v16  ;;  %v563_v2 = vadd.f32 %v3028_v33, %v3026_v24  ;;  %v1772_v16 = vrot.slane %v2367_v50, %v2497_v4  ;;  %v2369_v37 = vld [vmem:[%s3723_s1 + $0x6] sm:$0x3] }
 0x23b   :  { %564 = vadd.xlane.f32.xlu1 %v563_v2  ;;  %v566_v63 = vadd.f32 %v3032_v29, %v3030_v18  ;;  %v1824_v2 = vrot.slane %v2368_v54, %v2499_v5  ;;  %v1124_v54 = vld [vmem:[%s3729_s5] sm:$0xff] }
 0x23d   :  { %567 = vadd.xlane.f32.xlu0 %v566_v63  ;;  %v1868_v63 = vrot.slane %v2369_v37, %v2497_v4 }
 0x23f   :  { %1068 = vadd.xlane.f32.xlu1 %v1067_v12  ;;  %v2359_v12 = vld [vmem:[%s3723_s1 + $0xa] sm:$0x3] }
 0x240   :  { %v1395_v30 = vrot.slane %v2359_v12, %v2497_v4 }
 0x241   :  { %1065 = vadd.xlane.f32.xlu0 %v1064_v8  ;;  %v1343_v8 = vrot.slane %v2358_v13, %v2499_v5  ;;  %v2372_v13 = vld [vmem:[%s3723_s1 + $0xe] sm:$0x3] }
 0x2c8   :  { %v565_v11 = vpop.xlane.xlu1 %564 }
 0x2ca   :  { %v568_v38 = vpop.xlane.xlu0 %567 }
 0x2cc   :  { %v1069_v17 = vpop.xlane.xlu1 %1068 }
 0x2cd   :  { %v1071_v57 = vadd.f32 %v1069_v17, %v568_v38  ;;  %v1872_v38 = vrot.slane %v2369_v37, %v2499_v5  ;;  %v2024_v37 = vrot.slane %v2372_v13, %v2499_v5 }
 0x2ce   :  { %v1066_v58 = vpop.xlane.xlu0 %1065 }
 0x2cf   :  { %v3053_v15 = vmul.f32 0.001953125, %v1071_v57  ;;  %v1070_v40 = vadd.f32 %v1066_v58, %v565_v11  ;;  %v2370_v11 = vld [vmem:[%s3723_s1 + $0xa] sm:$0x3]  ;;  %v2360_v57 = vld [vmem:[%s3723_s1 + $0xc] sm:$0x3]  ;;  %v1399_v58 = vrot.slane %v2359_v12, %v2499_v5 }
 0x2d0   :  { %v1924_v17 = vrot.slane %v2370_v11, %v2497_v4 }
 0x2d1   :  { %v3055_v41 = vmul.f32 0.001953125, %v1070_v40  ;;  %v1080_v39 = vsub.f32 %v3030_v18, %v3053_v15  ;;  %v1081_v55 = vsub.f32 %v3032_v29, %v3053_v15  ;;  %v1100_v56 = vsub.f32 %v3034_v19, %v3053_v15 }
 0x2d2   :  { %v1101_v23 = vsub.f32 %v3036_v60, %v3053_v15  ;;  %v1443_v40 = vrot.slane %v2360_v57, %v2497_v4 }
 0x2d3   :  { %v1084_v47 = vmul.f32 %v1080_v39, %v1080_v39  ;;  %v1085_v45 = vmul.f32 %v1081_v55, %v1081_v55  ;;  %v1078_v46 = vsub.f32 %v3026_v24, %v3055_v41  ;;  %v1079_v62 = vsub.f32 %v3028_v33, %v3055_v41  ;;  %v2371_v39 = vld [vmem:[%s3723_s1 + $0xc] sm:$0x3] }
 0x2d4   :  { %v1104_v52 = vmul.f32 %v1100_v56, %v1100_v56  ;;  %v1098_v14 = vsub.f32 %v3040_v3, %v3055_v41  ;;  %v1099_v51 = vsub.f32 %v3042_v25, %v3055_v41  ;;  %v1105_v20 = vmul.f32 %v1101_v23, %v1101_v23  ;;  %v2361_v23 = vld [vmem:[%s3723_s1 + $0xe] sm:$0x3] }
 0x2d5   :  { %v1089_v0 = vadd.f32 %v1085_v45, %v1084_v47  ;;  %v1082_v6 = vmul.f32 %v1078_v46, %v1078_v46  ;;  %v1083_v9 = vmul.f32 %v1079_v62, %v1079_v62  ;;  %v1928_v55 = vrot.slane %v2370_v11, %v2499_v5 }
 0x2d6   :  { %v1102_v35 = vmul.f32 %v1098_v14, %v1098_v14  ;;  %v1103_v36 = vmul.f32 %v1099_v51, %v1099_v51  ;;  %v1109_v59 = vadd.f32 %v1105_v20, %v1104_v52  ;;  %v1972_v56 = vrot.slane %v2371_v39, %v2497_v4 }
 0x2d7   :  { %1090 = vadd.xlane.f32.xlu1 %v1089_v0  ;;  %v1086_v26 = vadd.f32 %v1083_v9, %v1082_v6  ;;  %v1447_v47 = vrot.slane %v2360_v57, %v2499_v5  ;;  %v1491_v45 = vrot.slane %v2361_v23, %v2497_v4  ;;  %v1976_v46 = vrot.slane %v2371_v39, %v2499_v5 }
 0x2d8   :  { %v1106_v61 = vadd.f32 %v1103_v36, %v1102_v35  ;;  %v1495_v62 = vrot.slane %v2361_v23, %v2499_v5 }
 0x2d9   :  { %1087 = vadd.xlane.f32.xlu0 %v1086_v26 }
 0x2db   :  { %1110 = vadd.xlane.f32.xlu1 %v1109_v59 }
 0x2dd   :  { %1107 = vadd.xlane.f32.xlu0 %v1106_v61 }
 0x2ec   :  { %1169 = vperm.xlu1 %2407, %v2355_v1  }
 0x2f0   :  { %1200 = vrot.lane.b32.xlu1 %v1195_v31, %s2422_s21 }
 0x2f3   :  { %1698 = vperm.xlu0 %2406, %v2355_v1  }
 0x2f4   :  { %1729 = vrot.lane.b32.xlu1 %v1724_v48, %s2422_s21 }
 0x2f7   :  { %1202 = vrot.lane.b32.xlu0 %v1199_v27, %s2422_s21  ;;  %v1114_v27 = vld [vmem:[%s3728_s4] sm:$0xff] }
 0x2f8   :  { %1248 = vrot.lane.b32.xlu1 %v1243_v49, %s2423_s26 }
 0x2fb   :  { %1731 = vrot.lane.b32.xlu0 %v1728_v44, %s2422_s21 }
 0x2fc   :  { %1777 = vrot.lane.b32.xlu1 %v1772_v16, %s2423_s26 }
 0x2ff   :  { %1250 = vrot.lane.b32.xlu0 %v1247_v43, %s2423_s26 }
 0x300   :  { %1296 = vrot.lane.b32.xlu1 %v1291_v53, %s2424_s12  ;;  %v1125_v53 = vld [vmem:[%s3729_s5 + $0x8] sm:$0xff] }
 0x303   :  { %1779 = vrot.lane.b32.xlu0 %v1776_v21, %s2423_s26 }
 0x304   :  { %1825 = vrot.lane.b32.xlu1 %v1820_v10, %s2424_s12 }
 0x307   :  { %1298 = vrot.lane.b32.xlu0 %v1295_v34, %s2424_s12 }
 0x308   :  { %1344 = vrot.lane.b32.xlu1 %v1339_v22, %s2425_s17 }
 0x30b   :  { %1827 = vrot.lane.b32.xlu0 %v1824_v2, %s2424_s12  ;;  %v2020_v2 = vrot.slane %v2372_v13, %v2497_v4 }
 0x30c   :  { %1873 = vrot.lane.b32.xlu1 %v1868_v63, %s2425_s17 }
 0x30f   :  { %1346 = vrot.lane.b32.xlu0 %v1343_v8, %s2425_s17 }
 0x310   :  { %1400 = vrot.lane.b32.xlu1 %v1395_v30, %s2426_s23 }
 0x313   :  { %1875 = vrot.lane.b32.xlu0 %v1872_v38, %s2425_s17  ;;  %v2373_v38 = vld [vmem:[%s3723_s1 + $0x10] sm:$0x3] }
 0x314   :  { %1929 = vrot.lane.b32.xlu1 %v1924_v17, %s2426_s23  ;;  %v2072_v57 = vrot.slane %v2373_v38, %v2499_v5 }
 0x317   :  { %1402 = vrot.lane.b32.xlu0 %v1399_v58, %s2426_s23  ;;  %v2068_v58 = vrot.slane %v2373_v38, %v2497_v4 }
 0x318   :  { %1448 = vrot.lane.b32.xlu1 %v1443_v40, %s2427_s29 }
 0x31b   :  { %1931 = vrot.lane.b32.xlu0 %v1928_v55, %s2426_s23 }
 0x31c   :  { %1977 = vrot.lane.b32.xlu1 %v1972_v56, %s2427_s29 }
 0x31f   :  { %1450 = vrot.lane.b32.xlu0 %v1447_v47, %s2427_s29 }
 0x320   :  { %1496 = vrot.lane.b32.xlu1 %v1491_v45, %s2428_s16 }
 0x323   :  { %1979 = vrot.lane.b32.xlu0 %v1976_v46, %s2427_s29 }
 0x327   :  { %1498 = vrot.lane.b32.xlu0 %v1495_v62, %s2428_s16 }
 0x364   :  { %v1091_v52 = vpop.xlane.xlu1 %1090 }
 0x366   :  { %v1088_v14 = vpop.xlane.xlu0 %1087 }
 0x368   :  { %v1111_v51 = vpop.xlane.xlu1 %1110 }
 0x369   :  { %v1113_v0 = vadd.f32 %v1111_v51, %v1091_v52 }
 0x36a   :  { %v1108_v6 = vpop.xlane.xlu0 %1107 }
 0x36b   :  { %v1117_v9 = vmul.f32 0.001953125, %v1113_v0  ;;  %v1112_v20 = vadd.f32 %v1108_v6, %v1088_v14 }
 0x36c   :  { %v3164_v26 = vpop.permute.xlu1 %1169 }
 0x36d   :  { %v1119_v35 = vadd.f32 1e-05, %v1117_v9  ;;  %v1116_v36 = vmul.f32 0.001953125, %v1112_v20 }
 0x36f   :  { %2414 = vrsqrt.f32 %v1119_v35  ;;  %v1118_v59 = vadd.f32 1e-05, %v1116_v36 }
 0x370   :  { %v3166_v61 = vpop.permute.xlu1 %1200 }
 0x371   :  { %2416 = vrsqrt.f32 %v1118_v59  ;;  %v1208_v40 = vmul.f32 0.0, %v3166_v61 }
 0x372   :  { %v3168_v1 = vpop.permute.xlu0 %1698 }
 0x373   :  { %v1214_v23 = vpack.c.bf16 %v1208_v40, %v1208_v40 }
 0x374   :  { %v3170_v7 = vpop.permute.xlu1 %1729 }
 0x375   :  { %v1737_v39 = vmul.f32 0.0, %v3170_v7 }
 0x376   :  { %v3172_v31 = vpop.permute.xlu0 %1202 }
 0x377   :  { %v1743_v47 = vpack.c.bf16 %v1737_v39, %v1737_v39 }
 0x378   :  { %v3177_v48 = vpop.permute.xlu1 %1248 }
 0x379   :  { %v2415_v32 = vpop.eup %2414  ;;  %v1256_v45 = vmul.f32 0.0, %v3177_v48 }
 0x37a   :  { %v1123_v49 = vmul.f32 %v2415_v32, %v1115_v28  ;;  %v3182_v50 = vpop.permute.xlu0 %1731 }
 0x37b   :  { %v2417_v44 = vpop.eup %2416  ;;  %v1262_v62 = vpack.c.bf16 %v1256_v45, %v1256_v45 }
 0x37c   :  { %1137 = vperm.xlu1 %2407, %v1123_v49   ;;  %v1122_v16 = vmul.f32 %v2417_v44, %v1114_v27  ;;  %v1127_v42 = vmul.f32 %v1123_v49, %v3053_v15  ;;  %v3185_v43 = vpop.permute.xlu1 %1777 }
 0x37e   :  { %1132 = vperm.xlu0 %2406, %v1122_v16   ;;  %v1126_v21 = vmul.f32 %v1122_v16, %v3055_v41  ;;  %v3194_v10 = vpop.permute.xlu0 %1250  ;;  %v1129_v15 = vsub.f32 %v1125_v53, %v1127_v42  ;;  %v2362_v41 = vld [vmem:[%s3723_s1 + $0x10] sm:$0x3] }
 0x37f   :  { %v1543_v8 = vrot.slane %v2362_v41, %v2499_v5  ;;  %v1539_v30 = vrot.slane %v2362_v41, %v2497_v4  ;;  %v1785_v5 = vmul.f32 0.0, %v3185_v43 }
 0x380   :  { %v1128_v34 = vsub.f32 %v1124_v54, %v1126_v21  ;;  %v3199_v22 = vpop.permute.xlu1 %1296 }
 0x381   :  { %v1791_v52 = vpack.c.bf16 %v1785_v5, %v1785_v5  ;;  %v1304_v14 = vmul.f32 0.0, %v3199_v22 }
 0x382   :  { %1151 = vperm.xlu0 %2406, %v1129_v15   ;;  %1146 = vperm.xlu1 %2407, %v1128_v34   ;;  %v3203_v63 = vpop.permute.xlu0 %1779 }
 0x383   :  { %v1310_v9 = vpack.c.bf16 %v1304_v14, %v1304_v14 }
 0x384   :  { %v3208_v12 = vpop.permute.xlu1 %1825 }
 0x385   :  { %v1833_v51 = vmul.f32 0.0, %v3208_v12 }
 0x386   :  { %2027 = vrot.lane.b32.xlu0 %v2024_v37, %s2428_s16  ;;  %2025 = vrot.lane.b32.xlu1 %v2020_v2, %s2428_s16  ;;  %v3214_v11 = vpop.permute.xlu0 %1298 }
 0x387   :  { %v1839_v20 = vpack.c.bf16 %v1833_v51, %v1833_v51 }
 0x388   :  { %v3219_v17 = vpop.permute.xlu1 %1344 }
 0x389   :  { %v1352_v35 = vmul.f32 0.0, %v3219_v17 }
 0x38a   :  { %1546 = vrot.lane.b32.xlu0 %v1543_v8, %s2429_s24  ;;  %1544 = vrot.lane.b32.xlu1 %v1539_v30, %s2429_s24  ;;  %v3227_v55 = vpop.permute.xlu0 %1827 }
 0x38b   :  { %v1358_v28 = vpack.c.bf16 %v1352_v35, %v1352_v35 }
 0x38c   :  { %v3229_v56 = vpop.permute.xlu1 %1873 }
 0x38d   :  { %v1881_v36 = vmul.f32 0.0, %v3229_v56 }
 0x38e   :  { %2075 = vrot.lane.b32.xlu0 %v2072_v57, %s2429_s24  ;;  %2073 = vrot.lane.b32.xlu1 %v2068_v58, %s2429_s24  ;;  %v3235_v46 = vpop.permute.xlu0 %1346 }
 0x38f   :  { %v1887_v32 = vpack.c.bf16 %v1881_v36, %v1881_v36 }
 0x390   :  { %v3237_v4 = vpop.permute.xlu1 %1400 }
 0x392   :  { %1220 = vrot.lane.b32.xlu1 %v1214_v23, %s2429_s24  ;;  %1749 = vrot.lane.b32.xlu0 %v1743_v47, %s2429_s24  ;;  %v3243_v0 = vpop.permute.xlu0 %1875 }
 0x394   :  { %v3245_v6 = vpop.permute.xlu1 %1929 }
 0x396   :  { %1268 = vrot.lane.b32.xlu1 %v1262_v62, %s2428_s16  ;;  %1797 = vrot.lane.b32.xlu0 %v1791_v52, %s2428_s16  ;;  %v3251_v59 = vpop.permute.xlu0 %1402 }
 0x397   :  { %v1410_v27 = vmul.f32 0.0, %v3251_v59 }
 0x398   :  { %v3258_v44 = vpop.permute.xlu1 %1448 }
 0x399   :  { %v1416_v16 = vpack.c.bf16 %v1410_v27, %v1410_v27 }
 0x39a   :  { %1316 = vrot.lane.b32.xlu1 %v1310_v9, %s2427_s29  ;;  %1845 = vrot.lane.b32.xlu0 %v1839_v20, %s2427_s29  ;;  %v3256_v49 = vpop.permute.xlu0 %1931 }
 0x39b   :  { %v1939_v42 = vmul.f32 0.0, %v3256_v49 }
 0x39c   :  { %v3265_v54 = vpop.permute.xlu1 %1977 }
 0x39d   :  { %v1945_v21 = vpack.c.bf16 %v1939_v42, %v1939_v42 }
 0x39e   :  { %1364 = vrot.lane.b32.xlu1 %v1358_v28, %s2426_s23  ;;  %1893 = vrot.lane.b32.xlu0 %v1887_v32, %s2426_s23  ;;  %v3263_v53 = vpop.permute.xlu0 %1450 }
 0x39f   :  { %v1458_v13 = vmul.f32 0.0, %v3263_v53 }
 0x3a0   :  { %v3280_v57 = vpop.permute.xlu1 %1496 }
 0x3a1   :  { %v1464_v37 = vpack.c.bf16 %v1458_v13, %v1458_v13 }
 0x3a2   :  { %1424 = vrot.lane.b32.xlu0 %v1416_v16, %s2425_s17  ;;  %v1980_v15 = vpop.permute.xlu0 %1979 }
 0x3a3   :  { %v3271_v34 = vsel %vm202_vm2, %v3265_v54, %v1980_v15  ;;  %v1987_v2 = vmul.f32 0.0, %v1980_v15 }
 0x3a5   :  { %v1993_v8 = vpack.c.bf16 %v1987_v2, %v1987_v2 }
 0x3a6   :  { %1953 = vrot.lane.b32.xlu0 %v1945_v21, %s2425_s17  ;;  %v3274_v41 = vpop.permute.xlu0 %1498 }
 0x3a7   :  { %v1506_v30 = vmul.f32 0.0, %v3274_v41 }
 0x3a9   :  { %v1512_v38 = vpack.c.bf16 %v1506_v30, %v1506_v30 }
 0x3aa   :  { %1472 = vrot.lane.b32.xlu0 %v1464_v37, %s2424_s12 }
 0x3ae   :  { %2001 = vrot.lane.b32.xlu0 %v1993_v8, %s2424_s12 }
 0x3b2   :  { %1520 = vrot.lane.b32.xlu0 %v1512_v38, %s2423_s26 }
 0x3fb   :  { %v1138_v58 = vpop.permute.xlu1 %1137 }
 0x3fc   :  { %v1142_v47 = vmul.f32 %v1138_v58, %v3030_v18  ;;  %v1143_v9 = vmul.f32 %v1138_v58, %v3032_v29  ;;  %v1681_v35 = vmul.f32 %v1138_v58, %v3034_v19 }
 0x3fd   :  { %v1133_v40 = vpop.permute.xlu0 %1132 }
 0x3fe   :  { %v1140_v39 = vmul.f32 %v1133_v40, %v3026_v24  ;;  %v1141_v23 = vmul.f32 %v1133_v40, %v3028_v33  ;;  %v1679_v62 = vmul.f32 %v1133_v40, %v3040_v3  ;;  %v1680_v52 = vmul.f32 %v1133_v40, %v3042_v25 }
 0x3ff   :  { %v1682_v24 = vmul.f32 %v1138_v58, %v3036_v60  ;;  %v1204_v60 = vsel %vm77_vm0, %v3166_v61, %v3172_v31 }
 0x401   :  { %v1147_v45 = vpop.permute.xlu1 %1146  ;;  %v1152_v5 = vpop.permute.xlu0 %1151 }
 0x402   :  { %v1154_v14 = vadd.f32 %v1147_v45, %v1140_v39  ;;  %v1155_v51 = vadd.f32 %v1147_v45, %v1141_v23  ;;  %v1156_v20 = vadd.f32 %v1152_v5, %v1142_v47  ;;  %v1683_v36 = vadd.f32 %v1679_v62, %v1147_v45 }
 0x403   :  { %v1684_v28 = vadd.f32 %v1680_v52, %v1147_v45  ;;  %v1157_v32 = vadd.f32 %v1152_v5, %v1143_v9  ;;  %v1685_v25 = vadd.f32 %v1681_v35, %v1152_v5  ;;  %v1686_v19 = vadd.f32 %v1682_v24, %v1152_v5 }
 0x404   :  { %v1172_v33 = vmul.f32 %v3164_v26, %v1154_v14  ;;  %v1173_v18 = vmul.f32 %v3164_v26, %v1155_v51  ;;  %vm1158_vm8 = vcmp.ge.f32.partialorder %v1154_v14, 0.0  ;;  %vm1159_vm9 = vcmp.ge.f32.partialorder %v1155_v51, 0.0 }
 0x405   :  { %v3292_v27 = vpop.permute.xlu1 %2025  ;;  %v3294_v3 = vpop.permute.xlu0 %2027  ;;  %vm1160_vm10 = vcmp.ge.f32.partialorder %v1156_v20, 0.0  ;;  %v1174_v29 = vmul.f32 %v3164_v26, %v1156_v20  ;;  %vm1687_vm11 = vcmp.ge.f32.partialorder %v1683_v36, 0.0  ;;  %vm1688_vm12 = vcmp.ge.f32.partialorder %v1684_v28, 0.0 }
 0x406   :  { %v1701_v16 = vmul.f32 %v3168_v1, %v1683_v36  ;;  %v3301_v42 = vsel %vm1158_vm8, %v1154_v14, %v1172_v33  ;;  %v3303_v21 = vsel %vm1159_vm9, %v1155_v51, %v1173_v18  ;;  %v1702_v13 = vmul.f32 %v3168_v1, %v1684_v28 }
 0x407   :  { %v1175_v15 = vmul.f32 %v3164_v26, %v1157_v32  ;;  %vm1161_vm13 = vcmp.ge.f32.partialorder %v1157_v32, 0.0  ;;  %v3309_v8 = vsel %vm1160_vm10, %v1156_v20, %v1174_v29  ;;  %vm1689_vm14 = vcmp.ge.f32.partialorder %v1685_v25, 0.0 }
 0x408   :  { %v2035_v61 = vmul.f32 0.0, %v3294_v3  ;;  %v1703_v30 = vmul.f32 %v3168_v1, %v1685_v25  ;;  %v1704_v38 = vmul.f32 %v3168_v1, %v1686_v19  ;;  %vm1690_vm15 = vcmp.ge.f32.partialorder %v1686_v19, 0.0 }
 0x409   :  { %v1545_v37 = vpop.permute.xlu1 %1544  ;;  %v3307_v2 = vpop.permute.xlu0 %1546  ;;  %v1209_v23 = vmul.f32 %v1204_v60, %v3301_v42  ;;  %v1733_v47 = vsel %vm77_vm0, %v3170_v7, %v3182_v50  ;;  %v3326_v45 = vsel %vm1161_vm13, %v1157_v32, %v1175_v15  ;;  %v3338_v14 = vsel %vm1687_vm11, %v1683_v36, %v1701_v16 }
 0x40a   :  { %v3315_v58 = vmul.f32 %v1545_v37, %v3301_v42  ;;  %v3318_v40 = vmul.f32 %v1545_v37, %v3309_v8  ;;  %v2041_v26 = vpack.c.bf16 %v2035_v61, %v2035_v61  ;;  %v1548_v39 = vsel %vm100_vm6, %v1545_v37, %v3307_v2 }
 0x40b   :  { %v3331_v5 = vmul.f32 %v1548_v39, %v3303_v21  ;;  %v3341_v51 = vsel %vm1688_vm12, %v1684_v28, %v1702_v13  ;;  %v3344_v7 = vmul.f32 %v1548_v39, %v3326_v45  ;;  %v1212_v9 = vmul.f32 %v1204_v60, %v3309_v8 }
 0x40c   :  { %v1558_v1 = vpack.c.bf16 %v3318_v40, %v3315_v58  ;;  %2049 = vrot.lane.b32.xlu0 %v2041_v26, %s2423_s26  ;;  %v3349_v20 = vsel %vm1689_vm14, %v1685_v25, %v1703_v30  ;;  %v3352_v35 = vsel %vm1690_vm15, %v1686_v19, %v1704_v38  ;;  %v1210_v28 = vmul.f32 %v3172_v31, %v3303_v21 }
 0x40d   :  { %v3333_v62 = vpop.permute.xlu1 %2073  ;;  %v3335_v52 = vpop.permute.xlu0 %2075  ;;  %v1559_v24 = vpack.c.bf16 %v3344_v7, %v3331_v5  ;;  %v1215_v33 = vpack.c.bf16 %v1212_v9, %v1209_v23  ;;  %v1213_v25 = vmul.f32 %v3172_v31, %v3326_v45  ;;  %v1738_v29 = vmul.f32 %v1733_v47, %v3338_v14 }
 0x40e   :  { %v2077_v36 = vsel %vm100_vm6, %v3333_v62, %v3335_v52  ;;  %v1741_v60 = vmul.f32 %v1733_v47, %v3349_v20  ;;  %v1252_v16 = vsel %vm128_vm1, %v3177_v48, %v3194_v10  ;;  %v1739_v15 = vmul.f32 %v3182_v50, %v3341_v51 }
 0x40f   :  { %v3362_v18 = vmul.f32 %v2077_v36, %v3341_v51  ;;  %v3365_v32 = vmul.f32 %v2077_v36, %v3352_v35  ;;  %1222 = vrot.lane.b32.xlu1 %v1215_v33, %s2429_s24  ;;  %v1216_v13 = vpack.c.bf16 %v1213_v25, %v1210_v28  ;;  %v1742_v31 = vmul.f32 %v3182_v50, %v3352_v35 }
 0x410   :  { %v1744_v37 = vpack.c.bf16 %v1741_v60, %v1738_v29  ;;  %v1257_v61 = vmul.f32 %v1252_v16, %v3301_v42  ;;  %v1260_v30 = vmul.f32 %v1252_v16, %v3309_v8  ;;  %v1781_v48 = vsel %vm128_vm1, %v3185_v43, %v3203_v63 }
 0x411   :  { %v2088_v19 = vpack.c.bf16 %v3365_v32, %v3362_v18  ;;  %1224 = vrot.lane.b32.xlu0 %v1216_v13, %s2429_s24  ;;  %v1745_v38 = vpack.c.bf16 %v1742_v31, %v1739_v15  ;;  %v1258_v26 = vmul.f32 %v3194_v10, %v3303_v21  ;;  %v1261_v50 = vmul.f32 %v3194_v10, %v3326_v45  ;;  %v1221_v18 = vpop.permute.xlu1 %1220 }
 0x412   :  { %v1263_v39 = vpack.c.bf16 %v1260_v30, %v1257_v61  ;;  %v1786_v23 = vmul.f32 %v1781_v48, %v3338_v14  ;;  %v1789_v47 = vmul.f32 %v1781_v48, %v3349_v20  ;;  %v1300_v43 = vsel %vm179_vm3, %v3199_v22, %v3214_v11 }
 0x413   :  { %1751 = vrot.lane.b32.xlu1 %v1744_v37, %s2429_s24  ;;  %v1264_v9 = vpack.c.bf16 %v1261_v50, %v1258_v26  ;;  %v1787_v36 = vmul.f32 %v3203_v63, %v3341_v51  ;;  %v1790_v10 = vmul.f32 %v3203_v63, %v3352_v35  ;;  %v1305_v33 = vmul.f32 %v1300_v43, %v3301_v42 }
 0x414   :  { %v1792_v28 = vpack.c.bf16 %v1789_v47, %v1786_v23  ;;  %v1308_v25 = vmul.f32 %v1300_v43, %v3309_v8  ;;  %v1306_v29 = vmul.f32 %v3214_v11, %v3303_v21  ;;  %v1309_v22 = vmul.f32 %v3214_v11, %v3326_v45 }
 0x415   :  { %1753 = vrot.lane.b32.xlu0 %v1745_v38, %s2429_s24  ;;  %v1829_v60 = vsel %vm179_vm3, %v3208_v12, %v3227_v55  ;;  %v1793_v63 = vpack.c.bf16 %v1790_v10, %v1787_v36  ;;  %v1348_v31 = vsel %vm230_vm5, %v3219_v17, %v3235_v46  ;;  %v1835_v11 = vmul.f32 %v3227_v55, %v3341_v51 }
 0x416   :  { %v1311_v16 = vpack.c.bf16 %v1308_v25, %v1305_v33  ;;  %v1834_v13 = vmul.f32 %v1829_v60, %v3338_v14  ;;  %v1837_v15 = vmul.f32 %v1829_v60, %v3349_v20  ;;  %v1312_v37 = vpack.c.bf16 %v1309_v22, %v1306_v29 }
 0x417   :  { %1270 = vrot.lane.b32.xlu1 %v1263_v39, %s2428_s16  ;;  %v1838_v12 = vmul.f32 %v3227_v55, %v3352_v35  ;;  %v3427_v61 = vmul.f32 %v3280_v57, %v3301_v42  ;;  %v1353_v30 = vmul.f32 %v1348_v31, %v3301_v42  ;;  %v1356_v48 = vmul.f32 %v1348_v31, %v3309_v8 }
 0x418   :  { %v3433_v17 = vmul.f32 %v3280_v57, %v3309_v8  ;;  %v1381_v38 = vpack.c.bf16 %v3326_v45, %v3303_v21  ;;  %v1840_v26 = vpack.c.bf16 %v1837_v15, %v1834_v13  ;;  %v1380_v50 = vpack.c.bf16 %v3309_v8, %v3301_v42 }
 0x419   :  { %1272 = vrot.lane.b32.xlu0 %v1264_v9, %s2428_s16  ;;  %v1910_v55 = vpack.c.bf16 %v3352_v35, %v3341_v51  ;;  %v1909_v39 = vpack.c.bf16 %v3349_v20, %v3338_v14  ;;  %v1877_v47 = vsel %vm230_vm5, %v3229_v56, %v3243_v0  ;;  %v1841_v43 = vpack.c.bf16 %v1838_v12, %v1835_v11 }
 0x41a   :  { %v1510_v23 = vpack.c.bf16 %v3433_v17, %v3427_v61  ;;  %v1354_v9 = vmul.f32 %v3235_v46, %v3303_v21  ;;  %v1357_v36 = vmul.f32 %v3235_v46, %v3326_v45  ;;  %v1359_v10 = vpack.c.bf16 %v1356_v48, %v1353_v30 }
 0x41b   :  { %1799 = vrot.lane.b32.xlu1 %v1792_v28, %s2428_s16  ;;  %v1882_v28 = vmul.f32 %v1877_v47, %v3338_v14  ;;  %v1885_v33 = vmul.f32 %v1877_v47, %v3349_v20  ;;  %v1404_v56 = vsel %vm253_vm7, %v3237_v4, %v3251_v59  ;;  %v1883_v29 = vmul.f32 %v3243_v0, %v3341_v51 }
 0x41c   :  { %v1360_v25 = vpack.c.bf16 %v1357_v36, %v1354_v9  ;;  %v1886_v46 = vmul.f32 %v3243_v0, %v3352_v35  ;;  %v1409_v60 = vmul.f32 %v1404_v56, %v3303_v21  ;;  %v1933_v59 = vsel %vm253_vm7, %v3245_v6, %v3256_v49 }
 0x41d   :  { %1801 = vrot.lane.b32.xlu0 %v1793_v63, %s2428_s16  ;;  %v1888_v22 = vpack.c.bf16 %v1885_v33, %v1882_v28  ;;  %v1412_v63 = vmul.f32 %v1404_v56, %v3326_v45  ;;  %v1938_v31 = vmul.f32 %v1933_v59, %v3341_v51  ;;  %v1941_v0 = vmul.f32 %v1933_v59, %v3352_v35 }
 0x41e   :  { %v1889_v13 = vpack.c.bf16 %v1886_v46, %v1883_v29  ;;  %v2083_v11 = vmul.f32 0.0, %v3335_v52  ;;  %v1408_v12 = vmul.f32 %v3237_v4, %v3301_v42  ;;  %v1411_v49 = vmul.f32 %v3237_v4, %v3309_v8 }
 0x41f   :  { %1318 = vrot.lane.b32.xlu1 %v1311_v16, %s2427_s29  ;;  %v1554_v16 = vmul.f32 0.0, %v3307_v2  ;;  %v1415_v15 = vpack.c.bf16 %v1412_v63, %v1409_v60  ;;  %v1944_v2 = vpack.c.bf16 %v1941_v0, %v1938_v31  ;;  %v1452_v52 = vsel %vm202_vm2, %v3258_v44, %v3263_v53 }
 0x420   :  { %v2089_v30 = vpack.c.bf16 %v2083_v11, %v2083_v11  ;;  %v1937_v48 = vmul.f32 %v3245_v6, %v3338_v14  ;;  %v1414_v47 = vpack.c.bf16 %v1411_v49, %v1408_v12  ;;  %v1460_v4 = vmul.f32 %v1452_v52, %v3326_v45 }
 0x421   :  { %1320 = vrot.lane.b32.xlu0 %v1312_v37, %s2427_s29  ;;  %v1560_v37 = vpack.c.bf16 %v1554_v16, %v1554_v16  ;;  %v1985_v36 = vmul.f32 %v3265_v54, %v3338_v14  ;;  %v1988_v53 = vmul.f32 %v3265_v54, %v3349_v20  ;;  %v1989_v28 = vmul.f32 %v3271_v34, %v3352_v35 }
 0x422   :  { %v2033_v33 = vmul.f32 %v3292_v27, %v3338_v14  ;;  %v2036_v56 = vmul.f32 %v3292_v27, %v3349_v20  ;;  %v1456_v54 = vmul.f32 %v3258_v44, %v3301_v42  ;;  %v1459_v46 = vmul.f32 %v3258_v44, %v3309_v8 }
 0x423   :  { %1847 = vrot.lane.b32.xlu1 %v1840_v26, %s2427_s29  ;;  %v1940_v26 = vmul.f32 %v3245_v6, %v3349_v20  ;;  %v1986_v6 = vmul.f32 %v3271_v34, %v3341_v51  ;;  %v1500_v34 = vsel %vm151_vm4, %v3280_v57, %v3274_v41  ;;  %v2081_v60 = vmul.f32 %v3333_v62, %v3338_v14 }
 0x424   :  { %v2084_v63 = vmul.f32 %v3333_v62, %v3349_v20  ;;  %v1462_v16 = vpack.c.bf16 %v1459_v46, %v1456_v54  ;;  %v1505_v59 = vmul.f32 %v1500_v34, %v3303_v21  ;;  %v1508_v44 = vmul.f32 %v1500_v34, %v3326_v45  ;;  %v1597_v62 = vld [vmem:[%s3730_s8 + $0x8] sm:$0xff] }
 0x425   :  { %1849 = vrot.lane.b32.xlu0 %v1841_v43, %s2427_s29  ;;  %v1457_v43 = vmul.f32 %v1452_v52, %v3303_v21  ;;  %v1943_v9 = vpack.c.bf16 %v1940_v26, %v1937_v48  ;;  %v1992_v29 = vpack.c.bf16 %v1989_v28, %v1986_v6 }
 0x426   :  { %v2087_v41 = vpack.c.bf16 %v2084_v63, %v2081_v60  ;;  %v1511_v31 = vpack.c.bf16 %v1508_v44, %v1505_v59 }
 0x427   :  { %1366 = vrot.lane.b32.xlu1 %v1359_v10, %s2426_s23  ;;  %v1463_v10 = vpack.c.bf16 %v1460_v4, %v1457_v43 }
 0x429   :  { %1368 = vrot.lane.b32.xlu0 %v1360_v25, %s2426_s23  ;;  %v1991_v25 = vpack.c.bf16 %v1988_v53, %v1985_v36 }
 0x42b   :  { %1895 = vrot.lane.b32.xlu1 %v1888_v22, %s2426_s23  ;;  %v2039_v22 = vpack.c.bf16 %v2036_v56, %v2033_v33 }
 0x42d   :  { %1897 = vrot.lane.b32.xlu0 %v1889_v13, %s2426_s23  ;;  %v2029_v13 = vsel %vm151_vm4, %v3292_v27, %v3294_v3  ;;  %v2411_v27 = vld [vmem:[%s3731_s7 + $0x4] ss:$8 sps:$4 sm:$0xff]   ;;  %v1750_v3 = vpop.permute.xlu0 %1749 }
 0x42e   :  { %v2034_v57 = vmul.f32 %v2029_v13, %v3341_v51  ;;  %2376 = vmatprep.mubr.msk.bf16.mxu1 %vm151_vm4, %v2411_v27  ;;  %2365 = vmatprep.mubr.msk.bf16.mxu0 %vm151_vm4, %v2411_v27 }
 0x42f   :  { %1422 = vrot.lane.b32.xlu1 %v1415_v15, %s2425_s17  ;;  %v2037_v15 = vmul.f32 %v2029_v13, %v3352_v35 }
 0x431   :  { %1568 = vrot.lane.b32.xlu0 %v1560_v37, %s2422_s21  ;;  %v2040_v0 = vpack.c.bf16 %v2037_v15, %v2034_v57  ;;  %v1798_v37 = vpop.permute.xlu0 %1797 }
 0x433   :  { %1951 = vrot.lane.b32.xlu1 %v1944_v2, %s2425_s17 }
 0x435   :  { %2097 = vrot.lane.b32.xlu0 %v2089_v30, %s2422_s21  ;;  %v1846_v61 = vpop.permute.xlu0 %1845 }
 0x437   :  { %1420 = vrot.lane.b32.xlu1 %v1414_v47, %s2425_s17 }
 0x439   :  { %1949 = vrot.lane.b32.xlu0 %v1943_v9, %s2425_s17  ;;  %v1894_v17 = vpop.permute.xlu0 %1893 }
 0x43b   :  { %1470 = vrot.lane.b32.xlu1 %v1463_v10, %s2424_s12 }
 0x43d   :  { %1997 = vrot.lane.b32.xlu0 %v1991_v25, %s2424_s12  ;;  %v1425_v5 = vpop.permute.xlu0 %1424 }
 0x43f   :  { %1999 = vrot.lane.b32.xlu1 %v1992_v29, %s2424_s12 }
 0x441   :  { %2045 = vrot.lane.b32.xlu0 %v2039_v22, %s2423_s26  ;;  %v3561_v7 = vpop.permute.xlu0 %1953 }
 0x443   :  { %1468 = vrot.lane.b32.xlu1 %v1462_v16, %s2424_s12 }
 0x445   :  { %2093 = vrot.lane.b32.xlu0 %v2087_v41, %s2422_s21 }
 0x447   :  { %1518 = vrot.lane.b32.xlu1 %v1511_v31, %s2423_s26 }
 0x449   :  { %1605 = vperm.xlu0 %2406, %v1597_v62  }
 0x44b   :  { %2047 = vrot.lane.b32.xlu1 %v2040_v0, %s2423_s26 }
 0x44d   :  { %2134 = vperm.xlu0 %2406, %v1597_v62  }
 0x44f   :  { %1516 = vrot.lane.b32.xlu1 %v1510_v23, %s2423_s26  ;;  %v1596_v23 = vld [vmem:[%s3730_s8] sm:$0xff] }
 0x453   :  { %1566 = vrot.lane.b32.xlu1 %v1559_v24, %s2422_s21  ;;  %v3563_v24 = vpop.permute.xlu0 %1472 }
 0x457   :  { %2095 = vrot.lane.b32.xlu1 %v2088_v19, %s2422_s21  ;;  %v3565_v32 = vpop.permute.xlu0 %2001  ;;  %v1269_v19 = vpop.permute.xlu1 %1268 }
 0x45b   :  { %1564 = vrot.lane.b32.xlu1 %v1558_v1, %s2422_s21  ;;  %v1317_v11 = vpop.permute.xlu1 %1316  ;;  %v3567_v2 = vpop.permute.xlu0 %1520 }
 0x45f   :  { %1600 = vperm.xlu1 %2407, %v1596_v23   ;;  %v1365_v58 = vpop.permute.xlu1 %1364 }
 0x463   :  { %2129 = vperm.xlu1 %2407, %v1596_v23  }
 0x47e   :  { %v3569_v40 = vpop.permute.xlu0 %2049 }
 0x481   :  { %v1223_v1 = vpop.permute.xlu1 %1222 }
 0x482   :  { %v1226_v52 = vsel %vm100_vm6, %v1221_v18, %v1223_v1 }
 0x483   :  { %v1225_v12 = vpop.permute.xlu0 %1224 }
 0x484   :  { %v1227_v30 = vsel %vm100_vm6, %v1223_v1, %v1225_v12 }
 0x485   :  { %v1752_v49 = vpop.permute.xlu1 %1751  ;;  %1620 = vmatprep.subr.bf16.mxu0 %v1227_v30 }
 0x486   :  { %1621 = vmatpush1.bf16.msra.mxu0 %v1226_v52  ;;  %v1755_v43 = vsel %vm100_vm6, %v1750_v3, %v1752_v49 }
 0x487   :  { %v1754_v48 = vpop.permute.xlu0 %1753 }
 0x488   :  { %v1756_v47 = vsel %vm100_vm6, %v1752_v49, %v1754_v48 }
 0x489   :  { %v1271_v26 = vpop.permute.xlu1 %1270  ;;  %2149 = vmatprep.subr.bf16.mxu1 %v1756_v47 }
 0x48a   :  { %2150 = vmatpush1.bf16.msra.mxu1 %v1755_v43  ;;  %v1274_v53 = vsel %vm151_vm4, %v1269_v19, %v1271_v26 }
 0x48b   :  { %v1273_v4 = vpop.permute.xlu0 %1272 }
 0x48c   :  { %v1275_v36 = vsel %vm151_vm4, %v1271_v26, %v1273_v4 }
 0x48d   :  { %v1800_v9 = vpop.permute.xlu1 %1799  ;;  %1622 = vmatprep.subr.bf16.mxu0 %v1275_v36 }
 0x48e   :  { %1623 = vmatpush1.bf16.msra.mxu0 %v1274_v53  ;;  %v1803_v33 = vsel %vm151_vm4, %v1798_v37, %v1800_v9 }
 0x48f   :  { %v1802_v10 = vpop.permute.xlu0 %1801 }
 0x490   :  { %v1804_v28 = vsel %vm151_vm4, %v1800_v9, %v1802_v10 }
 0x491   :  { %v1319_v6 = vpop.permute.xlu1 %1318  ;;  %2151 = vmatprep.subr.bf16.mxu1 %v1804_v28 }
 0x492   :  { %2152 = vmatpush1.bf16.msra.mxu1 %v1803_v33  ;;  %v1322_v54 = vsel %vm202_vm2, %v1317_v11, %v1319_v6 }
 0x493   :  { %v1321_v56 = vpop.permute.xlu0 %1320 }
 0x494   :  { %v1323_v29 = vsel %vm202_vm2, %v1319_v6, %v1321_v56 }
 0x495   :  { %v1848_v25 = vpop.permute.xlu1 %1847  ;;  %1624 = vmatprep.subr.bf16.mxu0 %v1323_v29 }
 0x496   :  { %1625 = vmatpush1.bf16.msra.mxu0 %v1322_v54  ;;  %v1851_v60 = vsel %vm202_vm2, %v1846_v61, %v1848_v25 }
 0x497   :  { %v1850_v46 = vpop.permute.xlu0 %1849 }
 0x498   :  { %v1852_v22 = vsel %vm202_vm2, %v1848_v25, %v1850_v46 }
 0x499   :  { %v1367_v34 = vpop.permute.xlu1 %1366  ;;  %2153 = vmatprep.subr.bf16.mxu1 %v1852_v22 }
 0x49a   :  { %2154 = vmatpush1.bf16.msra.mxu1 %v1851_v60  ;;  %v1370_v44 = vsel %vm253_vm7, %v1365_v58, %v1367_v34 }
 0x49b   :  { %v1369_v63 = vpop.permute.xlu0 %1368 }
 0x49c   :  { %v1371_v59 = vsel %vm253_vm7, %v1367_v34, %v1369_v63 }
 0x49d   :  { %v1896_v16 = vpop.permute.xlu1 %1895  ;;  %1626 = vmatprep.subr.bf16.mxu0 %v1371_v59 }
 0x49e   :  { %1627 = vmatpush1.bf16.msra.mxu0 %v1370_v44  ;;  %v1899_v15 = vsel %vm253_vm7, %v1894_v17, %v1896_v16 }
 0x49f   :  { %1628 = vmatprep.subr.bf16.mxu0 %v1381_v38  ;;  %v1898_v13 = vpop.permute.xlu0 %1897 }
 0x4a0   :  { %v1900_v57 = vsel %vm253_vm7, %v1896_v16, %v1898_v13 }
 0x4a1   :  { %v1423_v41 = vpop.permute.xlu1 %1422  ;;  %2155 = vmatprep.subr.bf16.mxu1 %v1900_v57 }
 0x4a2   :  { %v1427_v31 = vsel %vm230_vm5, %v1423_v41, %v1425_v5  ;;  %1629 = vmatpush1.bf16.msra.mxu0 %v1380_v50  ;;  %2156 = vmatpush1.bf16.msra.mxu1 %v1899_v15 }
 0x4a3   :  { %1630 = vmatprep.subr.bf16.mxu0 %v1427_v31  ;;  %2157 = vmatprep.subr.bf16.mxu1 %v1910_v55  ;;  %v1569_v21 = vpop.permute.xlu0 %1568 }
 0x4a5   :  { %v1952_v45 = vpop.permute.xlu1 %1951 }
 0x4a6   :  { %v1956_v38 = vsel %vm230_vm5, %v1952_v45, %v3561_v7  ;;  %2158 = vmatpush1.bf16.msra.mxu1 %v1909_v39 }
 0x4a7   :  { %2159 = vmatprep.subr.bf16.mxu1 %v1956_v38  ;;  %v2098_v62 = vpop.permute.xlu0 %2097 }
 0x4a9   :  { %v1421_v0 = vpop.permute.xlu1 %1420 }
 0x4aa   :  { %v1426_v42 = vsel %vm230_vm5, %v1421_v0, %v1423_v41 }
 0x4ab   :  { %1631 = vmatpush1.bf16.msra.mxu0 %v1426_v42  ;;  %v1950_v8 = vpop.permute.xlu0 %1949 }
 0x4ac   :  { %v1955_v50 = vsel %vm230_vm5, %v1950_v8, %v1952_v45 }
 0x4ad   :  { %v1471_v51 = vpop.permute.xlu1 %1470  ;;  %2160 = vmatpush1.bf16.msra.mxu1 %v1955_v50 }
 0x4ae   :  { %v1475_v35 = vsel %vm179_vm3, %v1471_v51, %v3563_v24 }
 0x4af   :  { %1632 = vmatprep.subr.bf16.mxu0 %v1475_v35  ;;  %v1998_v55 = vpop.permute.xlu0 %1997 }
 0x4b1   :  { %v2000_v27 = vpop.permute.xlu1 %1999 }
 0x4b2   :  { %v2003_v14 = vsel %vm179_vm3, %v1998_v55, %v2000_v27  ;;  %v2004_v20 = vsel %vm179_vm3, %v2000_v27, %v3565_v32 }
 0x4b3   :  { %2161 = vmatprep.subr.bf16.mxu1 %v2004_v20  ;;  %v2046_v17 = vpop.permute.xlu0 %2045 }
 0x4b4   :  { %2162 = vmatpush1.bf16.msra.mxu1 %v2003_v14 }
 0x4b5   :  { %v1469_v39 = vpop.permute.xlu1 %1468 }
 0x4b6   :  { %v1474_v3 = vsel %vm179_vm3, %v1469_v39, %v1471_v51 }
 0x4b7   :  { %1633 = vmatpush1.bf16.msra.mxu0 %v1474_v3  ;;  %v2094_v11 = vpop.permute.xlu0 %2093 }
 0x4b9   :  { %v1519_v37 = vpop.permute.xlu1 %1518 }
 0x4ba   :  { %v1523_v61 = vsel %vm128_vm1, %v1519_v37, %v3567_v2 }
 0x4bb   :  { %1634 = vmatprep.subr.bf16.mxu0 %v1523_v61 }
 0x4bd   :  { %v2048_v23 = vpop.permute.xlu1 %2047 }
 0x4be   :  { %v2051_v5 = vsel %vm128_vm1, %v2046_v17, %v2048_v23  ;;  %v2052_v7 = vsel %vm128_vm1, %v2048_v23, %v3569_v40  ;;  %v2413_v40 = vld [vmem:[%s3731_s7] ss:$8 sps:$4 sm:$0xff]  }
 0x4bf   :  { %2163 = vmatprep.subr.bf16.mxu1 %v2052_v7 }
 0x4c0   :  { %2164 = vmatpush1.bf16.msra.mxu1 %v2051_v5 }
 0x4c1   :  { %v1517_v24 = vpop.permute.xlu1 %1516 }
 0x4c2   :  { %v1522_v18 = vsel %vm128_vm1, %v1517_v24, %v1519_v37 }
 0x4c3   :  { %1635 = vmatpush1.bf16.msra.mxu0 %v1522_v18 }
 0x4c5   :  { %v1567_v32 = vpop.permute.xlu1 %1566 }
 0x4c6   :  { %v1571_v19 = vsel %vm77_vm0, %v1567_v32, %v1569_v21 }
 0x4c7   :  { %1636 = vmatprep.subr.bf16.mxu0 %v1571_v19 }
 0x4c8   :  { %v1606_v30 = vpop.permute.xlu0 %1605 }
 0x4c9   :  { %v2096_v2 = vpop.permute.xlu1 %2095 }
 0x4ca   :  { %v2099_v58 = vsel %vm77_vm0, %v2094_v11, %v2096_v2  ;;  %v2100_v1 = vsel %vm77_vm0, %v2096_v2, %v2098_v62 }
 0x4cb   :  { %2165 = vmatprep.subr.bf16.mxu1 %v2100_v1 }
 0x4cc   :  { %2166 = vmatpush1.bf16.msra.mxu1 %v2099_v58  ;;  %v2135_v6 = vpop.permute.xlu0 %2134 }
 0x4cd   :  { %v1565_v12 = vpop.permute.xlu1 %1564 }
 0x4ce   :  { %v1570_v49 = vsel %vm77_vm0, %v1565_v12, %v1567_v32  ;;  %v2248_v12 = vld [vmem:[%s3732_s9 + $0x8] sm:$0xff] }
 0x4cf   :  { %1637 = vmatpush1.bf16.msra.mxu0 %v1570_v49  ;;  %2182 = vmatmul.mubr.bf16.vlgmr.msra.gmra.mrb[4].mxu1 %v2413_v40 }
 0x4d2   :  { %1653 = vmatmul.mubr.bf16.vlgmr.msra.gmra.mrb[4].mxu0 %v2413_v40 }
 0x4de   :  { %v1601_v26 = vpop.permute.xlu1 %1600 }
 0x4e2   :  { %v2130_v46 = vpop.permute.xlu1 %2129 }
 0x5a2   :  { %v2183_v52 = vpop.f32.mrb[4].mxu1 }
 0x5a3   :  { %v2185_v48 = vpop.f32.mrb[5].mxu1  ;;  %v3637_v34 = vadd.f32 %v2183_v52, %v2130_v46 }
 0x5a4   :  { %v2187_v47 = vpop.f32.mrb[6].mxu1  ;;  %v3639_v22 = vadd.f32 %v2185_v48, %v2130_v46 }
 0x5a5   :  { %v1654_v43 = vpop.f32.mrb[4].mxu0  ;;  %v2189_v4 = vpop.f32.mrb[7].mxu1  ;;  %v3629_v56 = vadd.f32 %v2187_v47, %v2135_v6 }
 0x5a6   :  { %v3623_v9 = vadd.f32 %v1654_v43, %v1601_v26  ;;  %v1656_v36 = vpop.f32.mrb[5].mxu0  ;;  %v3631_v25 = vadd.f32 %v2189_v4, %v2135_v6  ;;  %v2197_v16 = vadd.f32 %v3639_v22, %v3637_v34  ;;  %v2258_v43 = vld [vmem:[%s3733_s10 + $0x8] sm:$0xff]  ;;  %v2257_v4 = vld [vmem:[%s3733_s10] sm:$0xff] }
 0x5a7   :  { %v3625_v53 = vadd.f32 %v1656_v36, %v1601_v26  ;;  %v1658_v10 = vpop.f32.mrb[6].mxu0 }
 0x5a8   :  { %v3627_v28 = vadd.f32 %v1658_v10, %v1606_v30  ;;  %v1660_v33 = vpop.f32.mrb[7].mxu0  ;;  %v2200_v63 = vadd.f32 %v3631_v25, %v3629_v56 }
 0x5a9   :  { %v1667_v29 = vadd.f32 %v3625_v53, %v3623_v9  ;;  %v3635_v54 = vadd.f32 %v1660_v33, %v1606_v30  ;;  %v2247_v30 = vld [vmem:[%s3732_s9] sm:$0xff] }
 0x5ab   :  { %v1670_v60 = vadd.f32 %v3635_v54, %v3627_v28  ;;  %1668 = vadd.xlane.f32.xlu1 %v1667_v29 }
 0x5ad   :  { %1671 = vadd.xlane.f32.xlu0 %v1670_v60 }
 0x5af   :  { %2201 = vadd.xlane.f32.xlu1 %v2200_v63  ;;  %v2293_v63 = vld [vmem:[%s3724_s0 + $0x10] sm:$0xff] }
 0x5b1   :  { %2198 = vadd.xlane.f32.xlu0 %v2197_v16  ;;  %v2294_v16 = vld [vmem:[%s3724_s0 + $0x18] sm:$0xff] }
 0x638   :  { %v1669_v59 = vpop.xlane.xlu1 %1668 }
 0x63a   :  { %v1672_v44 = vpop.xlane.xlu0 %1671 }
 0x63c   :  { %v2202_v13 = vpop.xlane.xlu1 %2201 }
 0x63d   :  { %v2204_v41 = vadd.f32 %v2202_v13, %v1672_v44  ;;  %v2391_v13 = vld [vmem:[%s3724_s0 + $0x30] sm:$0xff] }
 0x63e   :  { %v2199_v57 = vpop.xlane.xlu0 %2198 }
 0x63f   :  { %v2206_v15 = vmul.f32 0.001953125, %v2204_v41  ;;  %v2203_v31 = vadd.f32 %v2199_v57, %v1669_v59 }
 0x641   :  { %v2205_v21 = vmul.f32 0.001953125, %v2203_v31  ;;  %v2213_v45 = vsub.f32 %v3627_v28, %v2206_v15  ;;  %v2214_v38 = vsub.f32 %v3635_v54, %v2206_v15  ;;  %v2233_v62 = vsub.f32 %v3629_v56, %v2206_v15 }
 0x642   :  { %v2234_v0 = vsub.f32 %v3631_v25, %v2206_v15 }
 0x643   :  { %v2217_v42 = vmul.f32 %v2213_v45, %v2213_v45  ;;  %v2218_v8 = vmul.f32 %v2214_v38, %v2214_v38  ;;  %v2211_v50 = vsub.f32 %v3623_v9, %v2205_v21  ;;  %v2212_v51 = vsub.f32 %v3625_v53, %v2205_v21 }
 0x644   :  { %v2237_v35 = vmul.f32 %v2233_v62, %v2233_v62  ;;  %v2231_v55 = vsub.f32 %v3637_v34, %v2205_v21  ;;  %v2232_v27 = vsub.f32 %v3639_v22, %v2205_v21  ;;  %v2238_v3 = vmul.f32 %v2234_v0, %v2234_v0  ;;  %v2292_v0 = vld [vmem:[%s3724_s0 + $0x8] sm:$0xff] }
 0x645   :  { %v2222_v14 = vadd.f32 %v2218_v8, %v2217_v42  ;;  %v2215_v20 = vmul.f32 %v2211_v50, %v2211_v50  ;;  %v2216_v39 = vmul.f32 %v2212_v51, %v2212_v51 }
 0x646   :  { %v2235_v61 = vmul.f32 %v2231_v55, %v2231_v55  ;;  %v2236_v17 = vmul.f32 %v2232_v27, %v2232_v27  ;;  %v2242_v23 = vadd.f32 %v2238_v3, %v2237_v35 }
 0x647   :  { %2223 = vadd.xlane.f32.xlu1 %v2222_v14  ;;  %v2219_v37 = vadd.f32 %v2216_v39, %v2215_v20 }
 0x648   :  { %v2239_v5 = vadd.f32 %v2236_v17, %v2235_v61 }
 0x649   :  { %2220 = vadd.xlane.f32.xlu0 %v2219_v37 }
 0x64b   :  { %2243 = vadd.xlane.f32.xlu1 %v2242_v23 }
 0x64d   :  { %2240 = vadd.xlane.f32.xlu0 %v2239_v5 }
 0x6d4   :  { %v2224_v7 = vpop.xlane.xlu1 %2223 }
 0x6d6   :  { %v2221_v24 = vpop.xlane.xlu0 %2220 }
 0x6d8   :  { %v2244_v18 = vpop.xlane.xlu1 %2243 }
 0x6d9   :  { %v2246_v32 = vadd.f32 %v2244_v18, %v2224_v7 }
 0x6da   :  { %v2241_v19 = vpop.xlane.xlu0 %2240 }
 0x6db   :  { %v2250_v11 = vmul.f32 0.001953125, %v2246_v32  ;;  %v2245_v2 = vadd.f32 %v2241_v19, %v2221_v24 }
 0x6dd   :  { %v2252_v58 = vadd.f32 1e-05, %v2250_v11  ;;  %v2249_v1 = vmul.f32 0.001953125, %v2245_v2 }
 0x6df   :  { %2418 = vrsqrt.f32 %v2252_v58  ;;  %v2251_v40 = vadd.f32 1e-05, %v2249_v1 }
 0x6e1   :  { %2420 = vrsqrt.f32 %v2251_v40 }
 0x6e9   :  { %v2419_v49 = vpop.eup %2418 }
 0x6ea   :  { %v2256_v52 = vmul.f32 %v2419_v49, %v2248_v12 }
 0x6eb   :  { %v2421_v48 = vpop.eup %2420 }
 0x6ec   :  { %2270 = vperm.xlu1 %2407, %v2256_v52   ;;  %v2255_v26 = vmul.f32 %v2421_v48, %v2247_v30  ;;  %v2260_v47 = vmul.f32 %v2256_v52, %v2206_v15  ;;  %v2291_v15 = vld [vmem:[%s3724_s0] sm:$0xff] }
 0x6ee   :  { %2265 = vperm.xlu0 %2406, %v2255_v26   ;;  %v2259_v36 = vmul.f32 %v2255_v26, %v2205_v21  ;;  %v2262_v10 = vsub.f32 %v2258_v43, %v2260_v47 }
 0x6f0   :  { %v2261_v6 = vsub.f32 %v2257_v4, %v2259_v36 }
 0x6f2   :  { %2284 = vperm.xlu0 %2406, %v2262_v10   ;;  %2279 = vperm.xlu1 %2407, %v2261_v6  }
 0x76b   :  { %v2271_v33 = vpop.permute.xlu1 %2270 }
 0x76c   :  { %v2275_v46 = vmul.f32 %v2271_v33, %v3627_v28  ;;  %v2276_v60 = vmul.f32 %v2271_v33, %v3635_v54  ;;  %v2309_v59 = vmul.f32 %v2271_v33, %v3629_v56  ;;  %v2310_v44 = vmul.f32 %v2271_v33, %v3631_v25  ;;  %v2392_v28 = vld [vmem:[%s3724_s0 + $0x38] sm:$0xff] }
 0x76d   :  { %v2266_v29 = vpop.permute.xlu0 %2265 }
 0x76e   :  { %v2273_v41 = vmul.f32 %v2266_v29, %v3623_v9  ;;  %v2274_v57 = vmul.f32 %v2266_v29, %v3625_v53  ;;  %v2307_v56 = vmul.f32 %v2266_v29, %v3637_v34  ;;  %v2308_v25 = vmul.f32 %v2266_v29, %v3639_v22  ;;  %v2389_v9 = vld [vmem:[%s3724_s0 + $0x20] sm:$0xff]  ;;  %v2390_v53 = vld [vmem:[%s3724_s0 + $0x28] sm:$0xff] }
 0x771   :  { %v2285_v54 = vpop.permute.xlu0 %2284  ;;  %v2280_v31 = vpop.permute.xlu1 %2279 }
 0x772   :  { %v2289_v21 = vadd.f32 %v2285_v54, %v2275_v46  ;;  %v2290_v45 = vadd.f32 %v2285_v54, %v2276_v60  ;;  %v2313_v38 = vadd.f32 %v2309_v59, %v2285_v54  ;;  %v2314_v62 = vadd.f32 %v2310_v44, %v2285_v54 }
 0x773   :  { %v2287_v34 = vadd.f32 %v2280_v31, %v2273_v41  ;;  %v2288_v42 = vadd.f32 %v2280_v31, %v2274_v57  ;;  %v2311_v22 = vadd.f32 %v2307_v56, %v2280_v31  ;;  %v2312_v8 = vadd.f32 %v2308_v25, %v2280_v31 }
 0x774   :  { %v2297_v50 = vadd.f32 %v2293_v63, %v2289_v21  ;;  %v2298_v51 = vadd.f32 %v2294_v16, %v2290_v45  ;;  %v2321_v35 = vadd.f32 %v2391_v13, %v2313_v38  ;;  %v2322_v55 = vadd.f32 %v2392_v28, %v2314_v62 }
 0x775   :  { %v2295_v27 = vadd.f32 %v2291_v15, %v2287_v34  ;;  %v2296_v14 = vadd.f32 %v2292_v0, %v2288_v42  ;;  %v2319_v20 = vadd.f32 %v2389_v9, %v2311_v22  ;;  %v2320_v39 = vadd.f32 %v2390_v53, %v2312_v8 }
 0x776   :  { %2301 = vst [vmem:[%s3734_s11 + $0x10] sm:$0xff] %v2297_v50  ;;  %2302 = vst [vmem:[%s3734_s11 + $0x18] sm:$0xff] %v2298_v51 }
 0x777   :  { %2395 = vst [vmem:[%s3734_s11 + $0x30] sm:$0xff] %v2321_v35  ;;  %2396 = vst [vmem:[%s3734_s11 + $0x38] sm:$0xff] %v2322_v55 }
 0x778   :  { %2299 = vst [vmem:[%s3734_s11] sm:$0xff] %v2295_v27  ;;  %2300 = vst [vmem:[%s3734_s11 + $0x8] sm:$0xff] %v2296_v14 }
 0x779   :  { %2393 = vst [vmem:[%s3734_s11 + $0x20] sm:$0xff] %v2319_v20  ;;  %2394 = vst [vmem:[%s3734_s11 + $0x28] sm:$0xff] %v2320_v39 }

</bundles_post_ra>
